<compile_context>
chip_gen: v7x
topology: tpu7x:2x2x1
jax: 0.10.0
libtpu: 0.0.40
codegen_flags: <defaults>
</compile_context>

<pallas_src>
import functools

import jax
import jax.numpy as jnp
from jax.experimental import pallas as pl
from jax.experimental.pallas import tpu as pltpu

_VMEM_LIMIT = 48 * 1024 * 1024  # headroom below 64 MiB (v7x) / 128 MiB (v5e/v6e)


# ------------------------------------------------------------------
# Tiled linear projection:  y = x @ W.T (+ b),  W in torch layout (N, K)
# ------------------------------------------------------------------
def _linear_kernel(x_ref, w_ref, b_ref, o_ref, acc_ref, *, use_bf16):
    k = pl.program_id(2)

    @pl.when(k == 0)
    def _init():
        acc_ref[...] = jnp.zeros_like(acc_ref) + b_ref[...].astype(jnp.float32)

    x = x_ref[...]
    w = w_ref[...]
    if use_bf16:  # v6e/v7x: bf16 MXU operands, f32 accumulation
        x = x.astype(jnp.bfloat16)
        w = w.astype(jnp.bfloat16)
    acc_ref[...] += jax.lax.dot_general(
        x, w, (((1,), (1,)), ((), ())),  # contract K of x with K of W (trans_b)
        preferred_element_type=jnp.float32)

    @pl.when(k == pl.num_programs(2) - 1)
    def _flush():
        o_ref[...] = acc_ref[...].astype(o_ref.dtype)


def _pick_tile(dim, target, align):
    """Largest `align`-aligned divisor of dim that is <= target, else full dim."""
    if dim <= target:
        return dim
    t = (target // align) * align
    while t >= align:
        if dim % t == 0:
            return t
        t -= align
    return dim


def pallas_linear(x2d, weight, bias=None, *, use_bf16=False,
                  tm_target=256, tn_target=256, tk_target=512):
    m, k = x2d.shape
    n = weight.shape[0]  # torch layout (out_features, in_features)
    tm = _pick_tile(m, tm_target, 8)
    tn = _pick_tile(n, tn_target, 128)
    tk = _pick_tile(k, tk_target, 128)
    b2 = (jnp.zeros((1, n), x2d.dtype) if bias is None
          else bias.reshape(1, n).astype(x2d.dtype))
    return pl.pallas_call(
        functools.partial(_linear_kernel, use_bf16=use_bf16),
        out_shape=jax.ShapeDtypeStruct((m, n), x2d.dtype),
        grid=(m // tm, n // tn, k // tk),
        in_specs=[pl.BlockSpec((tm, tk), lambda i, j, kk: (i, kk)),
                  pl.BlockSpec((tn, tk), lambda i, j, kk: (j, kk)),
                  pl.BlockSpec((1, tn), lambda i, j, kk: (0, j))],
        out_specs=pl.BlockSpec((tm, tn), lambda i, j, kk: (i, j)),
        scratch_shapes=[pltpu.VMEM((tm, tn), jnp.float32)],
        compiler_params=pltpu.CompilerParams(
            dimension_semantics=("parallel", "parallel", "arbitrary"),
            vmem_limit_bytes=_VMEM_LIMIT),
    )(x2d, weight, b2)


# ------------------------------------------------------------------
# Fused relative attention kernel (one batch element per grid step)
# ------------------------------------------------------------------
def _fused_rel_attn_kernel(wh_ref, rk_ref, rwb_ref, rrb_ref, mask_ref,
                           out_ref, aw_ref, *, n_head, d_head, scale,
                           use_bf16):
    d_hid = n_head * d_head
    wh = wh_ref[...]                              # (T, 3*d_hid)  [q | k | v]
    rk = rk_ref[...]                              # (R, d_hid)
    rwb = rwb_ref[...]                            # (1, d_hid)
    rrb = rrb_ref[...]                            # (1, d_hid)
    mask = mask_ref[...].astype(jnp.float32)      # (T, S)

    t_len = wh.shape[0]
    s_len = mask.shape[1]
    r_len = rk.shape[0]                           # == s_len (mems=None path)

    mxu_dt = jnp.bfloat16 if use_bf16 else jnp.float32
    dn_nt = (((1,), (1,)), ((), ()))              # A @ B.T
    dn_nn = (((1,), (0,)), ((), ()))              # A @ B

    # Per-row left-roll amount of the Transformer-XL relative shift:
    #   shifted[i, j] = bd[i, (R-1-i) + j]   (valid / non-wrapping for j <= i)
    row = jax.lax.broadcasted_iota(jnp.int32, (t_len, r_len), 0)
    lshift = (r_len - 1) - row
    nbits = max((r_len - 1).bit_length(), 0)

    aw_acc = jnp.zeros((t_len, s_len), jnp.float32)
    head_outs = []
    for h in range(n_head):
        lo, hi = h * d_head, (h + 1) * d_head
        q = wh[:, lo:hi]
        k = wh[:, d_hid + lo:d_hid + hi]
        v = wh[:, 2 * d_hid + lo:2 * d_hid + hi]
        rkh = rk[:, lo:hi]

        rw_q = (q + rwb[:, lo:hi]).astype(mxu_dt)
        rr_q = (q + rrb[:, lo:hi]).astype(mxu_dt)

        ac = jax.lax.dot_general(rw_q, k.astype(mxu_dt), dn_nt,
                                 preferred_element_type=jnp.float32)  # (T, S)
        bd = jax.lax.dot_general(rr_q, rkh.astype(mxu_dt), dn_nt,
                                 preferred_element_type=jnp.float32)  # (T, R)

        # In-kernel relative shift: per-row cyclic left-roll by (R-1-i),
        # decomposed into log2(R) conditional uniform rolls (pure lane
        # shuffles, no HBM pad/concat/reshape round trip).  j > i entries wrap
        # and are masked by attn_mask, exactly as in the reference.
        for bit in range(nbits):
            amt = 1 << bit
            rolled = jnp.concatenate([bd[:, amt:], bd[:, :amt]], axis=-1)
            take = ((lshift >> bit) & 1) == 1
            bd = jnp.where(take, rolled, bd)

        logits = (ac + bd) * scale + mask
        mx = jnp.max(logits, axis=-1, keepdims=True)
        e = jnp.exp(logits - mx)
        denom = jnp.sum(e, axis=-1, keepdims=True)
        # NOTE: pl.reciprocal(denom, approx=True) moves this to the EUP slot
        # (recommended on v5e); kept exact here to hold the f32 verification
        # tolerance of the test below.
        p = e * pl.reciprocal(denom, approx=False)

        aw_acc = aw_acc + p
        o_h = jax.lax.dot_general(p.astype(mxu_dt), v.astype(mxu_dt), dn_nn,
                                  preferred_element_type=jnp.float32)  # (T, Dh)
        head_outs.append(o_h)

    # Single lane-dense (T, n_head*d_head) store; probs never hit HBM.
    out_ref[...] = jnp.concatenate(head_outs, axis=-1).astype(out_ref.dtype)
    aw_ref[...] = (aw_acc * (1.0 / n_head)).astype(aw_ref.dtype)


# ------------------------------------------------------------------
# Forward wrapper
# ------------------------------------------------------------------
def protected_mha_forward(query, r, r_w_bias, r_r_bias, attn_mask, params,
                          n_head, d_head, use_bf16=False):
    qlen, bsz, d_model = query.shape
    rlen = r.shape[0]
    d_hid = n_head * d_head
    klen = qlen                     # mems=None path
    assert d_hid == d_model, "module's final view requires n_head*d_head == d_model"
    assert rlen == klen, "AC + rel_shift(BD) requires rlen == klen"
    assert attn_mask is not None and attn_mask.shape == (qlen, klen)
    scale = 1.0 / (d_head ** 0.5)

    # One input-sized relayout so every downstream block is batch-major and
    # lane-dense; all later "transposes" are BlockSpec plumbing.
    x_btd = jnp.transpose(query, (1, 0, 2)).reshape(bsz * qlen, d_model)

    w_heads = pallas_linear(x_btd, params["qkv_w"], use_bf16=use_bf16)
    w_heads = w_heads.reshape(bsz, qlen, 3 * d_hid)        # (B, T, 3*H*Dh)
    r_head_k = pallas_linear(r, params["r_w"], use_bf16=use_bf16)  # (R, H*Dh)

    rwb = r_w_bias.reshape(1, d_hid)
    rrb = r_r_bias.reshape(1, d_hid)

    attn_ctx, attn_weights = pl.pallas_call(
        functools.partial(_fused_rel_attn_kernel, n_head=n_head, d_head=d_head,
                          scale=scale, use_bf16=use_bf16),
        out_shape=(jax.ShapeDtypeStruct((bsz, qlen, d_hid), jnp.float32),
                   jax.ShapeDtypeStruct((bsz, qlen, klen), jnp.float32)),
        grid=(bsz,),
        in_specs=[
            pl.BlockSpec((None, qlen, 3 * d_hid), lambda b: (b, 0, 0)),
            pl.BlockSpec((rlen, d_hid), lambda b: (0, 0)),
            pl.BlockSpec((1, d_hid), lambda b: (0, 0)),
            pl.BlockSpec((1, d_hid), lambda b: (0, 0)),
            pl.BlockSpec((qlen, klen), lambda b: (0, 0)),
        ],
        out_specs=(
            pl.BlockSpec((None, qlen, d_hid), lambda b: (b, 0, 0)),
            pl.BlockSpec((None, qlen, klen), lambda b: (b, 0, 0)),
        ),
        compiler_params=pltpu.CompilerParams(
            dimension_semantics=("parallel",),      # megacore over batch
            vmem_limit_bytes=_VMEM_LIMIT),
    )(w_heads, r_head_k, rwb, rrb, attn_mask.astype(jnp.float32))
    # TODO(synk): for very long sequences the (T, S) per-(batch,head) score
    #             tile should additionally be blocked along klen.

    out = pallas_linear(attn_ctx.reshape(bsz * qlen, d_hid),
                        params["out_w"], params["out_b"], use_bf16=use_bf16)
    out = jnp.transpose(out.reshape(bsz, qlen, d_model), (1, 0, 2))  # (T, B, D)
    return out, attn_weights                                        # (B, T, S)


# ------------------------------------------------------------------
# Pure-JAX reference (same math, exact pad/reshape rel-shift) for verification
# ------------------------------------------------------------------
def _rel_shift_ref(x):
    q, r, b, n = x.shape
    zero_pad = jnp.zeros((q, 1, b, n), dtype=x.dtype)
    x_padded = jnp.concatenate([zero_pad, x], axis=1).reshape(r + 1, q, b, n)
    return x_padded[1:].reshape(q, r, b, n)


def reference_forward(query, r, r_w_bias, r_r_bias, attn_mask, params,
                      n_head, d_head):
    qlen, bsz, d_model = query.shape
    rlen = r.shape[0]
    klen = qlen
    scale = 1.0 / (d_head ** 0.5)
    w_heads = query @ params["qkv_w"].T
    r_head_k = (r @ params["r_w"].T).reshape(rlen, n_head, d_head)
    w_head_q, w_head_k, w_head_v = jnp.split(w_heads, 3, axis=-1)
    w_head_q = w_head_q.reshape(qlen, bsz, n_head, d_head)
    w_head_k = w_head_k.reshape(klen, bsz, n_head, d_head)
    w_head_v = w_head_v.reshape(klen, bsz, n_head, d_head)
    AC = jnp.einsum('ibnd,jbnd->ijbn', w_head_q + r_w_bias, w_head_k)
    BD = _rel_shift_ref(jnp.einsum('ibnd,jnd->ijbn', w_head_q + r_r_bias,
                                   r_head_k))
    attn_score = (AC + BD) * scale                              # (T, S, B, H)
    logits = jnp.transpose(attn_score, (2, 3, 0, 1)) + attn_mask[None, None]
    probs = jax.nn.softmax(logits, axis=-1)                     # (B, H, T, S)
    ctx = jnp.einsum('bhts,sbhd->tbhd', probs, w_head_v)
    ctx = ctx.reshape(qlen, bsz, n_head * d_head)
    out = ctx @ params["out_w"].T + params["out_b"]
    aw = probs.sum(axis=1) / n_head                             # (B, T, S)
    return out, aw


# ------------------------------------------------------------------
if __name__ == "__main__":
    n_head, d_head = 4, 8
    d_model = n_head * d_head          # 32
    qlen, bsz = 8, 2
    rlen = qlen

    key = jax.random.PRNGKey(0)
    ks = jax.random.split(key, 8)

    def xavier(k, shape):
        fan_out, fan_in = shape
        lim = (6.0 / (fan_in + fan_out)) ** 0.5
        return jax.random.uniform(k, shape, jnp.float32, -lim, lim)

    params = {
        "qkv_w": xavier(ks[0], (3 * n_head * d_head, d_model)),  # qkv_net.weight
        "r_w":   xavier(ks[1], (n_head * d_head, d_model)),      # r_net.weight
        "out_w": xavier(ks[2], (d_model, d_model)),              # out_proj.weight
        "out_b": jnp.zeros((d_model,), jnp.float32),             # out_proj.bias
    }

    query = jax.random.normal(ks[3], (qlen, bsz, d_model), jnp.float32)
    r = jax.random.normal(ks[4], (rlen, d_model), jnp.float32)
    r_w_bias = 0.1 * jax.random.normal(ks[5], (n_head, d_head), jnp.float32)
    r_r_bias = 0.1 * jax.random.normal(ks[6], (n_head, d_head), jnp.float32)
    # causal additive attention mask (T x T)
    attn_mask = jnp.triu(jnp.ones((qlen, qlen), jnp.float32), k=1) * (-1e9)

    fwd = jax.jit(functools.partial(protected_mha_forward,
                                    n_head=n_head, d_head=d_head,
                                    use_bf16=False))
    out, attn_w = fwd(query, r, r_w_bias, r_r_bias, attn_mask, params)
    jax.block_until_ready((out, attn_w))

    ref_out, ref_w = reference_forward(query, r, r_w_bias, r_r_bias, attn_mask,
                                       params, n_head, d_head)
    assert out.shape == (qlen, bsz, d_model)
    assert attn_w.shape == (bsz, qlen, qlen)
    assert jnp.allclose(out, ref_out, atol=1e-4, rtol=1e-4)
    assert jnp.allclose(attn_w, ref_w, atol=1e-5, rtol=1e-4)

    # bf16 MXU-operand mode (recommended for v6e/v7x); softmax math stays f32,
    # so only operand-rounding error remains -> loose tolerance smoke test.
    fwd_bf16 = jax.jit(functools.partial(protected_mha_forward,
                                         n_head=n_head, d_head=d_head,
                                         use_bf16=True))
    out16, attn_w16 = fwd_bf16(query, r, r_w_bias, r_r_bias, attn_mask, params)
    jax.block_until_ready((out16, attn_w16))
    assert jnp.allclose(out16, ref_out, atol=5e-2, rtol=5e-2)
    assert jnp.allclose(attn_w16, ref_w, atol=5e-2, rtol=5e-2)

    print("KERNEL_OK")
</pallas_src>

<mosaic_0001>
module attributes {stable_mosaic.version = 11 : i64} {
  func.func @_linear_kernel(%arg0: i32, %arg1: i32, %arg2: i32, %arg3: memref<16x32xf32, #tpu.memory_space<vmem>>, %arg4: memref<96x32xf32, #tpu.memory_space<vmem>>, %arg5: memref<1x96xf32, #tpu.memory_space<vmem>>, %arg6: memref<16x96xf32, #tpu.memory_space<vmem>>, %arg7: memref<16x96xf32, #tpu.memory_space<vmem>>) attributes {dimension_semantics = [#tpu.dimension_semantics<parallel>, #tpu.dimension_semantics<parallel>, #tpu.dimension_semantics<arbitrary>], iteration_bounds = array<i64: 1, 1, 1>, scalar_prefetch = 0 : i64, scratch_operands = 1 : i64, tpu.core_type = #tpu.core_type<tc>, window_params = [{transform_indices = @transform_0, window_bounds = array<i64: 16, 32>}, {transform_indices = @transform_1, window_bounds = array<i64: 96, 32>}, {transform_indices = @transform_2, window_bounds = array<i64: 1, 96>}, {transform_indices = @transform_3, window_bounds = array<i64: 16, 96>}]} {
    %c0_i32 = arith.constant 0 : i32
    %0 = arith.cmpi eq, %arg2, %c0_i32 : i32
    %1 = arith.extui %0 : i1 to i32
    %c0_i32_0 = arith.constant 0 : i32
    %2 = arith.cmpi ne, %1, %c0_i32_0 : i32
    scf.if %2 {
      %cst_10 = arith.constant 0.000000e+00 : f32
      %12 = vector.broadcast %cst_10 : f32 to vector<16x96xf32>
      %c0_11 = arith.constant 0 : index
      %c0_12 = arith.constant 0 : index
      %13 = vector.load %arg5[%c0_11, %c0_12] : memref<1x96xf32, #tpu.memory_space<vmem>>, vector<1x96xf32>
      %14 = vector.broadcast %13 : vector<1x96xf32> to vector<16x96xf32>
      %15 = arith.addf %12, %14 : vector<16x96xf32>
      %c0_13 = arith.constant 0 : index
      %c0_14 = arith.constant 0 : index
      %16 = vector.load %arg7[%c0_13, %c0_14] : memref<16x96xf32, #tpu.memory_space<vmem>>, vector<16x96xf32>
      tpu.vector_store %arg7[%c0_13, %c0_14], %15 {strides = array<i32>} : memref<16x96xf32, #tpu.memory_space<vmem>>, vector<16x96xf32>,
    } else {
    }
    %c0 = arith.constant 0 : index
    %c0_1 = arith.constant 0 : index
    %3 = vector.load %arg3[%c0, %c0_1] : memref<16x32xf32, #tpu.memory_space<vmem>>, vector<16x32xf32>
    %c0_2 = arith.constant 0 : index
    %c0_3 = arith.constant 0 : index
    %4 = vector.load %arg4[%c0_2, %c0_3] : memref<96x32xf32, #tpu.memory_space<vmem>>, vector<96x32xf32>
    %c0_4 = arith.constant 0 : index
    %c0_5 = arith.constant 0 : index
    %5 = vector.load %arg7[%c0_4, %c0_5] : memref<16x96xf32, #tpu.memory_space<vmem>>, vector<16x96xf32>
    %cst = arith.constant dense<0.000000e+00> : vector<16x96xf32>
    %6 = tpu.matmul %3, %4, %cst {dimension_numbers = #tpu.dot_dimension_numbers<[1], [1], [0], [0], [0, 0, 1, 0], [], []>} : vector<16x32xf32>, vector<96x32xf32>, vector<16x96xf32> -> vector<16x96xf32>
    %7 = arith.addf %5, %6 : vector<16x96xf32>
    %c0_6 = arith.constant 0 : index
    %c0_7 = arith.constant 0 : index
    %8 = vector.load %arg7[%c0_6, %c0_7] : memref<16x96xf32, #tpu.memory_space<vmem>>, vector<16x96xf32>
    tpu.vector_store %arg7[%c0_6, %c0_7], %7 {strides = array<i32>} : memref<16x96xf32, #tpu.memory_space<vmem>>, vector<16x96xf32>,
    %c0_i32_8 = arith.constant 0 : i32
    %9 = arith.cmpi eq, %arg2, %c0_i32_8 : i32
    %10 = arith.extui %9 : i1 to i32
    %c0_i32_9 = arith.constant 0 : i32
    %11 = arith.cmpi ne, %10, %c0_i32_9 : i32
    scf.if %11 {
      %c0_10 = arith.constant 0 : index
      %c0_11 = arith.constant 0 : index
      %12 = vector.load %arg7[%c0_10, %c0_11] : memref<16x96xf32, #tpu.memory_space<vmem>>, vector<16x96xf32>
      %c0_12 = arith.constant 0 : index
      %c0_13 = arith.constant 0 : index
      %13 = vector.load %arg6[%c0_12, %c0_13] : memref<16x96xf32, #tpu.memory_space<vmem>>, vector<16x96xf32>
      tpu.vector_store %arg6[%c0_12, %c0_13], %12 {strides = array<i32>} : memref<16x96xf32, #tpu.memory_space<vmem>>, vector<16x96xf32>,
    } else {
    }
    return
  }
  func.func @transform_0(%arg0: i32, %arg1: i32, %arg2: i32) -> (i32, i32) {
    %c0_i32 = arith.constant 0 : i32
    return %arg0, %arg2 : i32, i32
  }
  func.func @transform_1(%arg0: i32, %arg1: i32, %arg2: i32) -> (i32, i32) {
    %c0_i32 = arith.constant 0 : i32
    return %arg1, %arg2 : i32, i32
  }
  func.func @transform_2(%arg0: i32, %arg1: i32, %arg2: i32) -> (i32, i32) {
    %c0_i32 = arith.constant 0 : i32
    %c0_i32_0 = arith.constant 0 : i32
    return %c0_i32, %arg1 : i32, i32
  }
  func.func @transform_3(%arg0: i32, %arg1: i32, %arg2: i32) -> (i32, i32) {
    %c0_i32 = arith.constant 0 : i32
    return %arg0, %arg1 : i32, i32
  }
}

module attributes {stable_mosaic.version = 11 : i64} {
  func.func @_linear_kernel(%arg0: i32, %arg1: i32, %arg2: i32, %arg3: memref<8x32xf32, #tpu.memory_space<vmem>>, %arg4: memref<32x32xf32, #tpu.memory_space<vmem>>, %arg5: memref<1x32xf32, #tpu.memory_space<vmem>>, %arg6: memref<8x32xf32, #tpu.memory_space<vmem>>, %arg7: memref<8x32xf32, #tpu.memory_space<vmem>>) attributes {dimension_semantics = [#tpu.dimension_semantics<parallel>, #tpu.dimension_semantics<parallel>, #tpu.dimension_semantics<arbitrary>], iteration_bounds = array<i64: 1, 1, 1>, scalar_prefetch = 0 : i64, scratch_operands = 1 : i64, tpu.core_type = #tpu.core_type<tc>, window_params = [{transform_indices = @transform_0, window_bounds = array<i64: 8, 32>}, {transform_indices = @transform_1, window_bounds = array<i64: 32, 32>}, {transform_indices = @transform_2, window_bounds = array<i64: 1, 32>}, {transform_indices = @transform_3, window_bounds = array<i64: 8, 32>}]} {
    %c0_i32 = arith.constant 0 : i32
    %0 = arith.cmpi eq, %arg2, %c0_i32 : i32
    %1 = arith.extui %0 : i1 to i32
    %c0_i32_0 = arith.constant 0 : i32
    %2 = arith.cmpi ne, %1, %c0_i32_0 : i32
    scf.if %2 {
      %cst_10 = arith.constant 0.000000e+00 : f32
      %12 = vector.broadcast %cst_10 : f32 to vector<8x32xf32>
      %c0_11 = arith.constant 0 : index
      %c0_12 = arith.constant 0 : index
      %13 = vector.load %arg5[%c0_11, %c0_12] : memref<1x32xf32, #tpu.memory_space<vmem>>, vector<1x32xf32>
      %14 = vector.broadcast %13 : vector<1x32xf32> to vector<8x32xf32>
      %15 = arith.addf %12, %14 : vector<8x32xf32>
      %c0_13 = arith.constant 0 : index
      %c0_14 = arith.constant 0 : index
      %16 = vector.load %arg7[%c0_13, %c0_14] : memref<8x32xf32, #tpu.memory_space<vmem>>, vector<8x32xf32>
      tpu.vector_store %arg7[%c0_13, %c0_14], %15 {strides = array<i32>} : memref<8x32xf32, #tpu.memory_space<vmem>>, vector<8x32xf32>,
    } else {
    }
    %c0 = arith.constant 0 : index
    %c0_1 = arith.constant 0 : index
    %3 = vector.load %arg3[%c0, %c0_1] : memref<8x32xf32, #tpu.memory_space<vmem>>, vector<8x32xf32>
    %c0_2 = arith.constant 0 : index
    %c0_3 = arith.constant 0 : index
    %4 = vector.load %arg4[%c0_2, %c0_3] : memref<32x32xf32, #tpu.memory_space<vmem>>, vector<32x32xf32>
    %c0_4 = arith.constant 0 : index
    %c0_5 = arith.constant 0 : index
    %5 = vector.load %arg7[%c0_4, %c0_5] : memref<8x32xf32, #tpu.memory_space<vmem>>, vector<8x32xf32>
    %cst = arith.constant dense<0.000000e+00> : vector<8x32xf32>
    %6 = tpu.matmul %3, %4, %cst {dimension_numbers = #tpu.dot_dimension_numbers<[1], [1], [0], [0], [0, 0, 1, 0], [], []>} : vector<8x32xf32>, vector<32x32xf32>, vector<8x32xf32> -> vector<8x32xf32>
    %7 = arith.addf %5, %6 : vector<8x32xf32>
    %c0_6 = arith.constant 0 : index
    %c0_7 = arith.constant 0 : index
    %8 = vector.load %arg7[%c0_6, %c0_7] : memref<8x32xf32, #tpu.memory_space<vmem>>, vector<8x32xf32>
    tpu.vector_store %arg7[%c0_6, %c0_7], %7 {strides = array<i32>} : memref<8x32xf32, #tpu.memory_space<vmem>>, vector<8x32xf32>,
    %c0_i32_8 = arith.constant 0 : i32
    %9 = arith.cmpi eq, %arg2, %c0_i32_8 : i32
    %10 = arith.extui %9 : i1 to i32
    %c0_i32_9 = arith.constant 0 : i32
    %11 = arith.cmpi ne, %10, %c0_i32_9 : i32
    scf.if %11 {
      %c0_10 = arith.constant 0 : index
      %c0_11 = arith.constant 0 : index
      %12 = vector.load %arg7[%c0_10, %c0_11] : memref<8x32xf32, #tpu.memory_space<vmem>>, vector<8x32xf32>
      %c0_12 = arith.constant 0 : index
      %c0_13 = arith.constant 0 : index
      %13 = vector.load %arg6[%c0_12, %c0_13] : memref<8x32xf32, #tpu.memory_space<vmem>>, vector<8x32xf32>
      tpu.vector_store %arg6[%c0_12, %c0_13], %12 {strides = array<i32>} : memref<8x32xf32, #tpu.memory_space<vmem>>, vector<8x32xf32>,
    } else {
    }
    return
  }
  func.func @transform_0(%arg0: i32, %arg1: i32, %arg2: i32) -> (i32, i32) {
    %c0_i32 = arith.constant 0 : i32
    return %arg0, %arg2 : i32, i32
  }
  func.func @transform_1(%arg0: i32, %arg1: i32, %arg2: i32) -> (i32, i32) {
    %c0_i32 = arith.constant 0 : i32
    return %arg1, %arg2 : i32, i32
  }
  func.func @transform_2(%arg0: i32, %arg1: i32, %arg2: i32) -> (i32, i32) {
    %c0_i32 = arith.constant 0 : i32
    %c0_i32_0 = arith.constant 0 : i32
    return %c0_i32, %arg1 : i32, i32
  }
  func.func @transform_3(%arg0: i32, %arg1: i32, %arg2: i32) -> (i32, i32) {
    %c0_i32 = arith.constant 0 : i32
    return %arg0, %arg1 : i32, i32
  }
}

module attributes {stable_mosaic.version = 11 : i64} {
  func.func @_linear_kernel(%arg0: i32, %arg1: i32, %arg2: i32, %arg3: memref<16x32xf32, #tpu.memory_space<vmem>>, %arg4: memref<32x32xf32, #tpu.memory_space<vmem>>, %arg5: memref<1x32xf32, #tpu.memory_space<vmem>>, %arg6: memref<16x32xf32, #tpu.memory_space<vmem>>, %arg7: memref<16x32xf32, #tpu.memory_space<vmem>>) attributes {dimension_semantics = [#tpu.dimension_semantics<parallel>, #tpu.dimension_semantics<parallel>, #tpu.dimension_semantics<arbitrary>], iteration_bounds = array<i64: 1, 1, 1>, scalar_prefetch = 0 : i64, scratch_operands = 1 : i64, tpu.core_type = #tpu.core_type<tc>, window_params = [{transform_indices = @transform_0, window_bounds = array<i64: 16, 32>}, {transform_indices = @transform_1, window_bounds = array<i64: 32, 32>}, {transform_indices = @transform_2, window_bounds = array<i64: 1, 32>}, {transform_indices = @transform_3, window_bounds = array<i64: 16, 32>}]} {
    %c0_i32 = arith.constant 0 : i32
    %0 = arith.cmpi eq, %arg2, %c0_i32 : i32
    %1 = arith.extui %0 : i1 to i32
    %c0_i32_0 = arith.constant 0 : i32
    %2 = arith.cmpi ne, %1, %c0_i32_0 : i32
    scf.if %2 {
      %cst_10 = arith.constant 0.000000e+00 : f32
      %12 = vector.broadcast %cst_10 : f32 to vector<16x32xf32>
      %c0_11 = arith.constant 0 : index
      %c0_12 = arith.constant 0 : index
      %13 = vector.load %arg5[%c0_11, %c0_12] : memref<1x32xf32, #tpu.memory_space<vmem>>, vector<1x32xf32>
      %14 = vector.broadcast %13 : vector<1x32xf32> to vector<16x32xf32>
      %15 = arith.addf %12, %14 : vector<16x32xf32>
      %c0_13 = arith.constant 0 : index
      %c0_14 = arith.constant 0 : index
      %16 = vector.load %arg7[%c0_13, %c0_14] : memref<16x32xf32, #tpu.memory_space<vmem>>, vector<16x32xf32>
      tpu.vector_store %arg7[%c0_13, %c0_14], %15 {strides = array<i32>} : memref<16x32xf32, #tpu.memory_space<vmem>>, vector<16x32xf32>,
    } else {
    }
    %c0 = arith.constant 0 : index
    %c0_1 = arith.constant 0 : index
    %3 = vector.load %arg3[%c0, %c0_1] : memref<16x32xf32, #tpu.memory_space<vmem>>, vector<16x32xf32>
    %c0_2 = arith.constant 0 : index
    %c0_3 = arith.constant 0 : index
    %4 = vector.load %arg4[%c0_2, %c0_3] : memref<32x32xf32, #tpu.memory_space<vmem>>, vector<32x32xf32>
    %c0_4 = arith.constant 0 : index
    %c0_5 = arith.constant 0 : index
    %5 = vector.load %arg7[%c0_4, %c0_5] : memref<16x32xf32, #tpu.memory_space<vmem>>, vector<16x32xf32>
    %cst = arith.constant dense<0.000000e+00> : vector<16x32xf32>
    %6 = tpu.matmul %3, %4, %cst {dimension_numbers = #tpu.dot_dimension_numbers<[1], [1], [0], [0], [0, 0, 1, 0], [], []>} : vector<16x32xf32>, vector<32x32xf32>, vector<16x32xf32> -> vector<16x32xf32>
    %7 = arith.addf %5, %6 : vector<16x32xf32>
    %c0_6 = arith.constant 0 : index
    %c0_7 = arith.constant 0 : index
    %8 = vector.load %arg7[%c0_6, %c0_7] : memref<16x32xf32, #tpu.memory_space<vmem>>, vector<16x32xf32>
    tpu.vector_store %arg7[%c0_6, %c0_7], %7 {strides = array<i32>} : memref<16x32xf32, #tpu.memory_space<vmem>>, vector<16x32xf32>,
    %c0_i32_8 = arith.constant 0 : i32
    %9 = arith.cmpi eq, %arg2, %c0_i32_8 : i32
    %10 = arith.extui %9 : i1 to i32
    %c0_i32_9 = arith.constant 0 : i32
    %11 = arith.cmpi ne, %10, %c0_i32_9 : i32
    scf.if %11 {
      %c0_10 = arith.constant 0 : index
      %c0_11 = arith.constant 0 : index
      %12 = vector.load %arg7[%c0_10, %c0_11] : memref<16x32xf32, #tpu.memory_space<vmem>>, vector<16x32xf32>
      %c0_12 = arith.constant 0 : index
      %c0_13 = arith.constant 0 : index
      %13 = vector.load %arg6[%c0_12, %c0_13] : memref<16x32xf32, #tpu.memory_space<vmem>>, vector<16x32xf32>
      tpu.vector_store %arg6[%c0_12, %c0_13], %12 {strides = array<i32>} : memref<16x32xf32, #tpu.memory_space<vmem>>, vector<16x32xf32>,
    } else {
    }
    return
  }
  func.func @transform_0(%arg0: i32, %arg1: i32, %arg2: i32) -> (i32, i32) {
    %c0_i32 = arith.constant 0 : i32
    return %arg0, %arg2 : i32, i32
  }
  func.func @transform_1(%arg0: i32, %arg1: i32, %arg2: i32) -> (i32, i32) {
    %c0_i32 = arith.constant 0 : i32
    return %arg1, %arg2 : i32, i32
  }
  func.func @transform_2(%arg0: i32, %arg1: i32, %arg2: i32) -> (i32, i32) {
    %c0_i32 = arith.constant 0 : i32
    %c0_i32_0 = arith.constant 0 : i32
    return %c0_i32, %arg1 : i32, i32
  }
  func.func @transform_3(%arg0: i32, %arg1: i32, %arg2: i32) -> (i32, i32) {
    %c0_i32 = arith.constant 0 : i32
    return %arg0, %arg1 : i32, i32
  }
}

module attributes {stable_mosaic.version = 11 : i64} {
  func.func @_fused_rel_attn_kernel(%arg0: i32, %arg1: memref<1x8x96xf32, #tpu.memory_space<vmem>>, %arg2: memref<8x32xf32, #tpu.memory_space<vmem>>, %arg3: memref<1x32xf32, #tpu.memory_space<vmem>>, %arg4: memref<1x32xf32, #tpu.memory_space<vmem>>, %arg5: memref<8x8xf32, #tpu.memory_space<vmem>>, %arg6: memref<1x8x32xf32, #tpu.memory_space<vmem>>, %arg7: memref<1x8x8xf32, #tpu.memory_space<vmem>>) attributes {dimension_semantics = [#tpu.dimension_semantics<parallel>], iteration_bounds = array<i64: 2>, scalar_prefetch = 0 : i64, scratch_operands = 0 : i64, tpu.core_type = #tpu.core_type<tc>, window_params = [{transform_indices = @transform_0, window_bounds = array<i64: 1, 8, 96>}, {pipeline_mode = #tpu.pipeline_mode<synchronous>, transform_indices = @transform_1, window_bounds = array<i64: 8, 32>}, {pipeline_mode = #tpu.pipeline_mode<synchronous>, transform_indices = @transform_2, window_bounds = array<i64: 1, 32>}, {pipeline_mode = #tpu.pipeline_mode<synchronous>, transform_indices = @transform_3, window_bounds = array<i64: 1, 32>}, {pipeline_mode = #tpu.pipeline_mode<synchronous>, transform_indices = @transform_4, window_bounds = array<i64: 8, 8>}, {transform_indices = @transform_5, window_bounds = array<i64: 1, 8, 32>}, {transform_indices = @transform_6, window_bounds = array<i64: 1, 8, 8>}]} {
    %c0 = arith.constant 0 : index
    %c0_0 = arith.constant 0 : index
    %c0_1 = arith.constant 0 : index
    %0 = vector.load %arg1[%c0, %c0_0, %c0_1] : memref<1x8x96xf32, #tpu.memory_space<vmem>>, vector<1x8x96xf32>
    %1 = vector.shape_cast %0 : vector<1x8x96xf32> to vector<8x96xf32>
    %c0_2 = arith.constant 0 : index
    %c0_3 = arith.constant 0 : index
    %2 = vector.load %arg2[%c0_2, %c0_3] : memref<8x32xf32, #tpu.memory_space<vmem>>, vector<8x32xf32>
    %c0_4 = arith.constant 0 : index
    %c0_5 = arith.constant 0 : index
    %3 = vector.load %arg3[%c0_4, %c0_5] : memref<1x32xf32, #tpu.memory_space<vmem>>, vector<1x32xf32>
    %c0_6 = arith.constant 0 : index
    %c0_7 = arith.constant 0 : index
    %4 = vector.load %arg4[%c0_6, %c0_7] : memref<1x32xf32, #tpu.memory_space<vmem>>, vector<1x32xf32>
    %c0_8 = arith.constant 0 : index
    %c0_9 = arith.constant 0 : index
    %5 = vector.load %arg5[%c0_8, %c0_9] : memref<8x8xf32, #tpu.memory_space<vmem>>, vector<8x8xf32>
    %6 = tpu.iota {dimensions = array<i32: 0>} : vector<8x8xi32>
    %c7_i32 = arith.constant 7 : i32
    %7 = vector.broadcast %c7_i32 : i32 to vector<8x8xi32>
    %8 = arith.subi %7, %6 : vector<8x8xi32>
    %cst = arith.constant 0.000000e+00 : f32
    %9 = vector.broadcast %cst : f32 to vector<8x8xf32>
    %10 = vector.extract_strided_slice %1 {offsets = [0, 0], sizes = [8, 8], strides = [1, 1]} : vector<8x96xf32> to vector<8x8xf32>
    %11 = vector.extract_strided_slice %1 {offsets = [0, 32], sizes = [8, 8], strides = [1, 1]} : vector<8x96xf32> to vector<8x8xf32>
    %12 = vector.extract_strided_slice %1 {offsets = [0, 64], sizes = [8, 8], strides = [1, 1]} : vector<8x96xf32> to vector<8x8xf32>
    %13 = vector.extract_strided_slice %2 {offsets = [0, 0], sizes = [8, 8], strides = [1, 1]} : vector<8x32xf32> to vector<8x8xf32>
    %14 = vector.extract_strided_slice %3 {offsets = [0, 0], sizes = [1, 8], strides = [1, 1]} : vector<1x32xf32> to vector<1x8xf32>
    %15 = vector.broadcast %14 : vector<1x8xf32> to vector<8x8xf32>
    %16 = arith.addf %10, %15 : vector<8x8xf32>
    %17 = vector.extract_strided_slice %4 {offsets = [0, 0], sizes = [1, 8], strides = [1, 1]} : vector<1x32xf32> to vector<1x8xf32>
    %18 = vector.broadcast %17 : vector<1x8xf32> to vector<8x8xf32>
    %19 = arith.addf %10, %18 : vector<8x8xf32>
    %cst_10 = arith.constant dense<0.000000e+00> : vector<8x8xf32>
    %20 = tpu.matmul %16, %11, %cst_10 {dimension_numbers = #tpu.dot_dimension_numbers<[1], [1], [0], [0], [0, 0, 1, 0], [], []>} : vector<8x8xf32>, vector<8x8xf32>, vector<8x8xf32> -> vector<8x8xf32>
    %cst_11 = arith.constant dense<0.000000e+00> : vector<8x8xf32>
    %21 = tpu.matmul %19, %13, %cst_11 {dimension_numbers = #tpu.dot_dimension_numbers<[1], [1], [0], [0], [0, 0, 1, 0], [], []>} : vector<8x8xf32>, vector<8x8xf32>, vector<8x8xf32> -> vector<8x8xf32>
    %22 = vector.extract_strided_slice %21 {offsets = [0, 1], sizes = [8, 7], strides = [1, 1]} : vector<8x8xf32> to vector<8x7xf32>
    %23 = vector.extract_strided_slice %21 {offsets = [0, 0], sizes = [8, 1], strides = [1, 1]} : vector<8x8xf32> to vector<8x1xf32>
    %24 = tpu.concatenate %22, %23 in 1 : vector<8x7xf32>, vector<8x1xf32> -> vector<8x8xf32>
    %c0_i32 = arith.constant 0 : i32
    %25 = vector.broadcast %c0_i32 : i32 to vector<8x8xi32>
    %26 = arith.shrsi %8, %25 : vector<8x8xi32>
    %c1_i32 = arith.constant 1 : i32
    %27 = vector.broadcast %c1_i32 : i32 to vector<8x8xi32>
    %28 = arith.andi %26, %27 : vector<8x8xi32>
    %c1_i32_12 = arith.constant 1 : i32
    %29 = vector.broadcast %c1_i32_12 : i32 to vector<8x8xi32>
    %30 = arith.cmpi eq, %28, %29 : vector<8x8xi32>
    %31 = arith.select %30, %24, %21 : vector<8x8xi1>, vector<8x8xf32>
    %32 = vector.extract_strided_slice %31 {offsets = [0, 2], sizes = [8, 6], strides = [1, 1]} : vector<8x8xf32> to vector<8x6xf32>
    %33 = vector.extract_strided_slice %31 {offsets = [0, 0], sizes = [8, 2], strides = [1, 1]} : vector<8x8xf32> to vector<8x2xf32>
    %34 = tpu.concatenate %32, %33 in 1 : vector<8x6xf32>, vector<8x2xf32> -> vector<8x8xf32>
    %c1_i32_13 = arith.constant 1 : i32
    %35 = vector.broadcast %c1_i32_13 : i32 to vector<8x8xi32>
    %36 = arith.shrsi %8, %35 : vector<8x8xi32>
    %c1_i32_14 = arith.constant 1 : i32
    %37 = vector.broadcast %c1_i32_14 : i32 to vector<8x8xi32>
    %38 = arith.andi %36, %37 : vector<8x8xi32>
    %c1_i32_15 = arith.constant 1 : i32
    %39 = vector.broadcast %c1_i32_15 : i32 to vector<8x8xi32>
    %40 = arith.cmpi eq, %38, %39 : vector<8x8xi32>
    %41 = arith.select %40, %34, %31 : vector<8x8xi1>, vector<8x8xf32>
    %42 = vector.extract_strided_slice %41 {offsets = [0, 4], sizes = [8, 4], strides = [1, 1]} : vector<8x8xf32> to vector<8x4xf32>
    %43 = vector.extract_strided_slice %41 {offsets = [0, 0], sizes = [8, 4], strides = [1, 1]} : vector<8x8xf32> to vector<8x4xf32>
    %44 = tpu.concatenate %42, %43 in 1 : vector<8x4xf32>, vector<8x4xf32> -> vector<8x8xf32>
    %c2_i32 = arith.constant 2 : i32
    %45 = vector.broadcast %c2_i32 : i32 to vector<8x8xi32>
    %46 = arith.shrsi %8, %45 : vector<8x8xi32>
    %c1_i32_16 = arith.constant 1 : i32
    %47 = vector.broadcast %c1_i32_16 : i32 to vector<8x8xi32>
    %48 = arith.andi %46, %47 : vector<8x8xi32>
    %c1_i32_17 = arith.constant 1 : i32
    %49 = vector.broadcast %c1_i32_17 : i32 to vector<8x8xi32>
    %50 = arith.cmpi eq, %48, %49 : vector<8x8xi32>
    %51 = arith.select %50, %44, %41 : vector<8x8xi1>, vector<8x8xf32>
    %52 = arith.addf %20, %51 : vector<8x8xf32>
    %cst_18 = arith.constant 0.353553385 : f32
    %53 = vector.broadcast %cst_18 : f32 to vector<8x8xf32>
    %54 = arith.mulf %52, %53 : vector<8x8xf32>
    %55 = arith.addf %54, %5 : vector<8x8xf32>
    %cst_19 = arith.constant dense<0xFF800000> : vector<8xf32>
    %56 = vector.multi_reduction <maximumf>, %55, %cst_19 [1] : vector<8x8xf32> to vector<8xf32>
    %57 = vector.shape_cast %56 : vector<8xf32> to vector<8x1xf32>
    %58 = vector.broadcast %57 : vector<8x1xf32> to vector<8x8xf32>
    %59 = arith.subf %55, %58 : vector<8x8xf32>
    %60 = math.exp %59 : vector<8x8xf32>
    %cst_20 = arith.constant dense<0.000000e+00> : vector<8xf32>
    %61 = vector.multi_reduction <add>, %60, %cst_20 [1] : vector<8x8xf32> to vector<8xf32>
    %62 = vector.shape_cast %61 : vector<8xf32> to vector<8x1xf32>
    %63 = tpu.reciprocal %62 : vector<8x1xf32> -> vector<8x1xf32>
    %64 = vector.broadcast %63 : vector<8x1xf32> to vector<8x8xf32>
    %65 = arith.mulf %60, %64 : vector<8x8xf32>
    %66 = arith.addf %9, %65 : vector<8x8xf32>
    %cst_21 = arith.constant dense<0.000000e+00> : vector<8x8xf32>
    %67 = tpu.matmul %65, %12, %cst_21 {dimension_numbers = #tpu.dot_dimension_numbers<[1], [0], [0], [1], [0, 0, 1, 1], [], []>} : vector<8x8xf32>, vector<8x8xf32>, vector<8x8xf32> -> vector<8x8xf32>
    %68 = vector.extract_strided_slice %1 {offsets = [0, 8], sizes = [8, 8], strides = [1, 1]} : vector<8x96xf32> to vector<8x8xf32>
    %69 = vector.extract_strided_slice %1 {offsets = [0, 40], sizes = [8, 8], strides = [1, 1]} : vector<8x96xf32> to vector<8x8xf32>
    %70 = vector.extract_strided_slice %1 {offsets = [0, 72], sizes = [8, 8], strides = [1, 1]} : vector<8x96xf32> to vector<8x8xf32>
    %71 = vector.extract_strided_slice %2 {offsets = [0, 8], sizes = [8, 8], strides = [1, 1]} : vector<8x32xf32> to vector<8x8xf32>
    %72 = vector.extract_strided_slice %3 {offsets = [0, 8], sizes = [1, 8], strides = [1, 1]} : vector<1x32xf32> to vector<1x8xf32>
    %73 = vector.broadcast %72 : vector<1x8xf32> to vector<8x8xf32>
    %74 = arith.addf %68, %73 : vector<8x8xf32>
    %75 = vector.extract_strided_slice %4 {offsets = [0, 8], sizes = [1, 8], strides = [1, 1]} : vector<1x32xf32> to vector<1x8xf32>
    %76 = vector.broadcast %75 : vector<1x8xf32> to vector<8x8xf32>
    %77 = arith.addf %68, %76 : vector<8x8xf32>
    %cst_22 = arith.constant dense<0.000000e+00> : vector<8x8xf32>
    %78 = tpu.matmul %74, %69, %cst_22 {dimension_numbers = #tpu.dot_dimension_numbers<[1], [1], [0], [0], [0, 0, 1, 0], [], []>} : vector<8x8xf32>, vector<8x8xf32>, vector<8x8xf32> -> vector<8x8xf32>
    %cst_23 = arith.constant dense<0.000000e+00> : vector<8x8xf32>
    %79 = tpu.matmul %77, %71, %cst_23 {dimension_numbers = #tpu.dot_dimension_numbers<[1], [1], [0], [0], [0, 0, 1, 0], [], []>} : vector<8x8xf32>, vector<8x8xf32>, vector<8x8xf32> -> vector<8x8xf32>
    %80 = vector.extract_strided_slice %79 {offsets = [0, 1], sizes = [8, 7], strides = [1, 1]} : vector<8x8xf32> to vector<8x7xf32>
    %81 = vector.extract_strided_slice %79 {offsets = [0, 0], sizes = [8, 1], strides = [1, 1]} : vector<8x8xf32> to vector<8x1xf32>
    %82 = tpu.concatenate %80, %81 in 1 : vector<8x7xf32>, vector<8x1xf32> -> vector<8x8xf32>
    %c0_i32_24 = arith.constant 0 : i32
    %83 = vector.broadcast %c0_i32_24 : i32 to vector<8x8xi32>
    %84 = arith.shrsi %8, %83 : vector<8x8xi32>
    %c1_i32_25 = arith.constant 1 : i32
    %85 = vector.broadcast %c1_i32_25 : i32 to vector<8x8xi32>
    %86 = arith.andi %84, %85 : vector<8x8xi32>
    %c1_i32_26 = arith.constant 1 : i32
    %87 = vector.broadcast %c1_i32_26 : i32 to vector<8x8xi32>
    %88 = arith.cmpi eq, %86, %87 : vector<8x8xi32>
    %89 = arith.select %88, %82, %79 : vector<8x8xi1>, vector<8x8xf32>
    %90 = vector.extract_strided_slice %89 {offsets = [0, 2], sizes = [8, 6], strides = [1, 1]} : vector<8x8xf32> to vector<8x6xf32>
    %91 = vector.extract_strided_slice %89 {offsets = [0, 0], sizes = [8, 2], strides = [1, 1]} : vector<8x8xf32> to vector<8x2xf32>
    %92 = tpu.concatenate %90, %91 in 1 : vector<8x6xf32>, vector<8x2xf32> -> vector<8x8xf32>
    %c1_i32_27 = arith.constant 1 : i32
    %93 = vector.broadcast %c1_i32_27 : i32 to vector<8x8xi32>
    %94 = arith.shrsi %8, %93 : vector<8x8xi32>
    %c1_i32_28 = arith.constant 1 : i32
    %95 = vector.broadcast %c1_i32_28 : i32 to vector<8x8xi32>
    %96 = arith.andi %94, %95 : vector<8x8xi32>
    %c1_i32_29 = arith.constant 1 : i32
    %97 = vector.broadcast %c1_i32_29 : i32 to vector<8x8xi32>
    %98 = arith.cmpi eq, %96, %97 : vector<8x8xi32>
    %99 = arith.select %98, %92, %89 : vector<8x8xi1>, vector<8x8xf32>
    %100 = vector.extract_strided_slice %99 {offsets = [0, 4], sizes = [8, 4], strides = [1, 1]} : vector<8x8xf32> to vector<8x4xf32>
    %101 = vector.extract_strided_slice %99 {offsets = [0, 0], sizes = [8, 4], strides = [1, 1]} : vector<8x8xf32> to vector<8x4xf32>
    %102 = tpu.concatenate %100, %101 in 1 : vector<8x4xf32>, vector<8x4xf32> -> vector<8x8xf32>
    %c2_i32_30 = arith.constant 2 : i32
    %103 = vector.broadcast %c2_i32_30 : i32 to vector<8x8xi32>
    %104 = arith.shrsi %8, %103 : vector<8x8xi32>
    %c1_i32_31 = arith.constant 1 : i32
    %105 = vector.broadcast %c1_i32_31 : i32 to vector<8x8xi32>
    %106 = arith.andi %104, %105 : vector<8x8xi32>
    %c1_i32_32 = arith.constant 1 : i32
    %107 = vector.broadcast %c1_i32_32 : i32 to vector<8x8xi32>
    %108 = arith.cmpi eq, %106, %107 : vector<8x8xi32>
    %109 = arith.select %108, %102, %99 : vector<8x8xi1>, vector<8x8xf32>
    %110 = arith.addf %78, %109 : vector<8x8xf32>
    %cst_33 = arith.constant 0.353553385 : f32
    %111 = vector.broadcast %cst_33 : f32 to vector<8x8xf32>
    %112 = arith.mulf %110, %111 : vector<8x8xf32>
    %113 = arith.addf %112, %5 : vector<8x8xf32>
    %cst_34 = arith.constant dense<0xFF800000> : vector<8xf32>
    %114 = vector.multi_reduction <maximumf>, %113, %cst_34 [1] : vector<8x8xf32> to vector<8xf32>
    %115 = vector.shape_cast %114 : vector<8xf32> to vector<8x1xf32>
    %116 = vector.broadcast %115 : vector<8x1xf32> to vector<8x8xf32>
    %117 = arith.subf %113, %116 : vector<8x8xf32>
    %118 = math.exp %117 : vector<8x8xf32>
    %cst_35 = arith.constant dense<0.000000e+00> : vector<8xf32>
    %119 = vector.multi_reduction <add>, %118, %cst_35 [1] : vector<8x8xf32> to vector<8xf32>
    %120 = vector.shape_cast %119 : vector<8xf32> to vector<8x1xf32>
    %121 = tpu.reciprocal %120 : vector<8x1xf32> -> vector<8x1xf32>
    %122 = vector.broadcast %121 : vector<8x1xf32> to vector<8x8xf32>
    %123 = arith.mulf %118, %122 : vector<8x8xf32>
    %124 = arith.addf %66, %123 : vector<8x8xf32>
    %cst_36 = arith.constant dense<0.000000e+00> : vector<8x8xf32>
    %125 = tpu.matmul %123, %70, %cst_36 {dimension_numbers = #tpu.dot_dimension_numbers<[1], [0], [0], [1], [0, 0, 1, 1], [], []>} : vector<8x8xf32>, vector<8x8xf32>, vector<8x8xf32> -> vector<8x8xf32>
    %126 = vector.extract_strided_slice %1 {offsets = [0, 16], sizes = [8, 8], strides = [1, 1]} : vector<8x96xf32> to vector<8x8xf32>
    %127 = vector.extract_strided_slice %1 {offsets = [0, 48], sizes = [8, 8], strides = [1, 1]} : vector<8x96xf32> to vector<8x8xf32>
    %128 = vector.extract_strided_slice %1 {offsets = [0, 80], sizes = [8, 8], strides = [1, 1]} : vector<8x96xf32> to vector<8x8xf32>
    %129 = vector.extract_strided_slice %2 {offsets = [0, 16], sizes = [8, 8], strides = [1, 1]} : vector<8x32xf32> to vector<8x8xf32>
    %130 = vector.extract_strided_slice %3 {offsets = [0, 16], sizes = [1, 8], strides = [1, 1]} : vector<1x32xf32> to vector<1x8xf32>
    %131 = vector.broadcast %130 : vector<1x8xf32> to vector<8x8xf32>
    %132 = arith.addf %126, %131 : vector<8x8xf32>
    %133 = vector.extract_strided_slice %4 {offsets = [0, 16], sizes = [1, 8], strides = [1, 1]} : vector<1x32xf32> to vector<1x8xf32>
    %134 = vector.broadcast %133 : vector<1x8xf32> to vector<8x8xf32>
    %135 = arith.addf %126, %134 : vector<8x8xf32>
    %cst_37 = arith.constant dense<0.000000e+00> : vector<8x8xf32>
    %136 = tpu.matmul %132, %127, %cst_37 {dimension_numbers = #tpu.dot_dimension_numbers<[1], [1], [0], [0], [0, 0, 1, 0], [], []>} : vector<8x8xf32>, vector<8x8xf32>, vector<8x8xf32> -> vector<8x8xf32>
    %cst_38 = arith.constant dense<0.000000e+00> : vector<8x8xf32>
    %137 = tpu.matmul %135, %129, %cst_38 {dimension_numbers = #tpu.dot_dimension_numbers<[1], [1], [0], [0], [0, 0, 1, 0], [], []>} : vector<8x8xf32>, vector<8x8xf32>, vector<8x8xf32> -> vector<8x8xf32>
    %138 = vector.extract_strided_slice %137 {offsets = [0, 1], sizes = [8, 7], strides = [1, 1]} : vector<8x8xf32> to vector<8x7xf32>
    %139 = vector.extract_strided_slice %137 {offsets = [0, 0], sizes = [8, 1], strides = [1, 1]} : vector<8x8xf32> to vector<8x1xf32>
    %140 = tpu.concatenate %138, %139 in 1 : vector<8x7xf32>, vector<8x1xf32> -> vector<8x8xf32>
    %c0_i32_39 = arith.constant 0 : i32
    %141 = vector.broadcast %c0_i32_39 : i32 to vector<8x8xi32>
    %142 = arith.shrsi %8, %141 : vector<8x8xi32>
    %c1_i32_40 = arith.constant 1 : i32
    %143 = vector.broadcast %c1_i32_40 : i32 to vector<8x8xi32>
    %144 = arith.andi %142, %143 : vector<8x8xi32>
    %c1_i32_41 = arith.constant 1 : i32
    %145 = vector.broadcast %c1_i32_41 : i32 to vector<8x8xi32>
    %146 = arith.cmpi eq, %144, %145 : vector<8x8xi32>
    %147 = arith.select %146, %140, %137 : vector<8x8xi1>, vector<8x8xf32>
    %148 = vector.extract_strided_slice %147 {offsets = [0, 2], sizes = [8, 6], strides = [1, 1]} : vector<8x8xf32> to vector<8x6xf32>
    %149 = vector.extract_strided_slice %147 {offsets = [0, 0], sizes = [8, 2], strides = [1, 1]} : vector<8x8xf32> to vector<8x2xf32>
    %150 = tpu.concatenate %148, %149 in 1 : vector<8x6xf32>, vector<8x2xf32> -> vector<8x8xf32>
    %c1_i32_42 = arith.constant 1 : i32
    %151 = vector.broadcast %c1_i32_42 : i32 to vector<8x8xi32>
    %152 = arith.shrsi %8, %151 : vector<8x8xi32>
    %c1_i32_43 = arith.constant 1 : i32
    %153 = vector.broadcast %c1_i32_43 : i32 to vector<8x8xi32>
    %154 = arith.andi %152, %153 : vector<8x8xi32>
    %c1_i32_44 = arith.constant 1 : i32
    %155 = vector.broadcast %c1_i32_44 : i32 to vector<8x8xi32>
    %156 = arith.cmpi eq, %154, %155 : vector<8x8xi32>
    %157 = arith.select %156, %150, %147 : vector<8x8xi1>, vector<8x8xf32>
    %158 = vector.extract_strided_slice %157 {offsets = [0, 4], sizes = [8, 4], strides = [1, 1]} : vector<8x8xf32> to vector<8x4xf32>
    %159 = vector.extract_strided_slice %157 {offsets = [0, 0], sizes = [8, 4], strides = [1, 1]} : vector<8x8xf32> to vector<8x4xf32>
    %160 = tpu.concatenate %158, %159 in 1 : vector<8x4xf32>, vector<8x4xf32> -> vector<8x8xf32>
    %c2_i32_45 = arith.constant 2 : i32
    %161 = vector.broadcast %c2_i32_45 : i32 to vector<8x8xi32>
    %162 = arith.shrsi %8, %161 : vector<8x8xi32>
    %c1_i32_46 = arith.constant 1 : i32
    %163 = vector.broadcast %c1_i32_46 : i32 to vector<8x8xi32>
    %164 = arith.andi %162, %163 : vector<8x8xi32>
    %c1_i32_47 = arith.constant 1 : i32
    %165 = vector.broadcast %c1_i32_47 : i32 to vector<8x8xi32>
    %166 = arith.cmpi eq, %164, %165 : vector<8x8xi32>
    %167 = arith.select %166, %160, %157 : vector<8x8xi1>, vector<8x8xf32>
    %168 = arith.addf %136, %167 : vector<8x8xf32>
    %cst_48 = arith.constant 0.353553385 : f32
    %169 = vector.broadcast %cst_48 : f32 to vector<8x8xf32>
    %170 = arith.mulf %168, %169 : vector<8x8xf32>
    %171 = arith.addf %170, %5 : vector<8x8xf32>
    %cst_49 = arith.constant dense<0xFF800000> : vector<8xf32>
    %172 = vector.multi_reduction <maximumf>, %171, %cst_49 [1] : vector<8x8xf32> to vector<8xf32>
    %173 = vector.shape_cast %172 : vector<8xf32> to vector<8x1xf32>
    %174 = vector.broadcast %173 : vector<8x1xf32> to vector<8x8xf32>
    %175 = arith.subf %171, %174 : vector<8x8xf32>
    %176 = math.exp %175 : vector<8x8xf32>
    %cst_50 = arith.constant dense<0.000000e+00> : vector<8xf32>
    %177 = vector.multi_reduction <add>, %176, %cst_50 [1] : vector<8x8xf32> to vector<8xf32>
    %178 = vector.shape_cast %177 : vector<8xf32> to vector<8x1xf32>
    %179 = tpu.reciprocal %178 : vector<8x1xf32> -> vector<8x1xf32>
    %180 = vector.broadcast %179 : vector<8x1xf32> to vector<8x8xf32>
    %181 = arith.mulf %176, %180 : vector<8x8xf32>
    %182 = arith.addf %124, %181 : vector<8x8xf32>
    %cst_51 = arith.constant dense<0.000000e+00> : vector<8x8xf32>
    %183 = tpu.matmul %181, %128, %cst_51 {dimension_numbers = #tpu.dot_dimension_numbers<[1], [0], [0], [1], [0, 0, 1, 1], [], []>} : vector<8x8xf32>, vector<8x8xf32>, vector<8x8xf32> -> vector<8x8xf32>
    %184 = vector.extract_strided_slice %1 {offsets = [0, 24], sizes = [8, 8], strides = [1, 1]} : vector<8x96xf32> to vector<8x8xf32>
    %185 = vector.extract_strided_slice %1 {offsets = [0, 56], sizes = [8, 8], strides = [1, 1]} : vector<8x96xf32> to vector<8x8xf32>
    %186 = vector.extract_strided_slice %1 {offsets = [0, 88], sizes = [8, 8], strides = [1, 1]} : vector<8x96xf32> to vector<8x8xf32>
    %187 = vector.extract_strided_slice %2 {offsets = [0, 24], sizes = [8, 8], strides = [1, 1]} : vector<8x32xf32> to vector<8x8xf32>
    %188 = vector.extract_strided_slice %3 {offsets = [0, 24], sizes = [1, 8], strides = [1, 1]} : vector<1x32xf32> to vector<1x8xf32>
    %189 = vector.broadcast %188 : vector<1x8xf32> to vector<8x8xf32>
    %190 = arith.addf %184, %189 : vector<8x8xf32>
    %191 = vector.extract_strided_slice %4 {offsets = [0, 24], sizes = [1, 8], strides = [1, 1]} : vector<1x32xf32> to vector<1x8xf32>
    %192 = vector.broadcast %191 : vector<1x8xf32> to vector<8x8xf32>
    %193 = arith.addf %184, %192 : vector<8x8xf32>
    %cst_52 = arith.constant dense<0.000000e+00> : vector<8x8xf32>
    %194 = tpu.matmul %190, %185, %cst_52 {dimension_numbers = #tpu.dot_dimension_numbers<[1], [1], [0], [0], [0, 0, 1, 0], [], []>} : vector<8x8xf32>, vector<8x8xf32>, vector<8x8xf32> -> vector<8x8xf32>
    %cst_53 = arith.constant dense<0.000000e+00> : vector<8x8xf32>
    %195 = tpu.matmul %193, %187, %cst_53 {dimension_numbers = #tpu.dot_dimension_numbers<[1], [1], [0], [0], [0, 0, 1, 0], [], []>} : vector<8x8xf32>, vector<8x8xf32>, vector<8x8xf32> -> vector<8x8xf32>
    %196 = vector.extract_strided_slice %195 {offsets = [0, 1], sizes = [8, 7], strides = [1, 1]} : vector<8x8xf32> to vector<8x7xf32>
    %197 = vector.extract_strided_slice %195 {offsets = [0, 0], sizes = [8, 1], strides = [1, 1]} : vector<8x8xf32> to vector<8x1xf32>
    %198 = tpu.concatenate %196, %197 in 1 : vector<8x7xf32>, vector<8x1xf32> -> vector<8x8xf32>
    %c0_i32_54 = arith.constant 0 : i32
    %199 = vector.broadcast %c0_i32_54 : i32 to vector<8x8xi32>
    %200 = arith.shrsi %8, %199 : vector<8x8xi32>
    %c1_i32_55 = arith.constant 1 : i32
    %201 = vector.broadcast %c1_i32_55 : i32 to vector<8x8xi32>
    %202 = arith.andi %200, %201 : vector<8x8xi32>
    %c1_i32_56 = arith.constant 1 : i32
    %203 = vector.broadcast %c1_i32_56 : i32 to vector<8x8xi32>
    %204 = arith.cmpi eq, %202, %203 : vector<8x8xi32>
    %205 = arith.select %204, %198, %195 : vector<8x8xi1>, vector<8x8xf32>
    %206 = vector.extract_strided_slice %205 {offsets = [0, 2], sizes = [8, 6], strides = [1, 1]} : vector<8x8xf32> to vector<8x6xf32>
    %207 = vector.extract_strided_slice %205 {offsets = [0, 0], sizes = [8, 2], strides = [1, 1]} : vector<8x8xf32> to vector<8x2xf32>
    %208 = tpu.concatenate %206, %207 in 1 : vector<8x6xf32>, vector<8x2xf32> -> vector<8x8xf32>
    %c1_i32_57 = arith.constant 1 : i32
    %209 = vector.broadcast %c1_i32_57 : i32 to vector<8x8xi32>
    %210 = arith.shrsi %8, %209 : vector<8x8xi32>
    %c1_i32_58 = arith.constant 1 : i32
    %211 = vector.broadcast %c1_i32_58 : i32 to vector<8x8xi32>
    %212 = arith.andi %210, %211 : vector<8x8xi32>
    %c1_i32_59 = arith.constant 1 : i32
    %213 = vector.broadcast %c1_i32_59 : i32 to vector<8x8xi32>
    %214 = arith.cmpi eq, %212, %213 : vector<8x8xi32>
    %215 = arith.select %214, %208, %205 : vector<8x8xi1>, vector<8x8xf32>
    %216 = vector.extract_strided_slice %215 {offsets = [0, 4], sizes = [8, 4], strides = [1, 1]} : vector<8x8xf32> to vector<8x4xf32>
    %217 = vector.extract_strided_slice %215 {offsets = [0, 0], sizes = [8, 4], strides = [1, 1]} : vector<8x8xf32> to vector<8x4xf32>
    %218 = tpu.concatenate %216, %217 in 1 : vector<8x4xf32>, vector<8x4xf32> -> vector<8x8xf32>
    %c2_i32_60 = arith.constant 2 : i32
    %219 = vector.broadcast %c2_i32_60 : i32 to vector<8x8xi32>
    %220 = arith.shrsi %8, %219 : vector<8x8xi32>
    %c1_i32_61 = arith.constant 1 : i32
    %221 = vector.broadcast %c1_i32_61 : i32 to vector<8x8xi32>
    %222 = arith.andi %220, %221 : vector<8x8xi32>
    %c1_i32_62 = arith.constant 1 : i32
    %223 = vector.broadcast %c1_i32_62 : i32 to vector<8x8xi32>
    %224 = arith.cmpi eq, %222, %223 : vector<8x8xi32>
    %225 = arith.select %224, %218, %215 : vector<8x8xi1>, vector<8x8xf32>
    %226 = arith.addf %194, %225 : vector<8x8xf32>
    %cst_63 = arith.constant 0.353553385 : f32
    %227 = vector.broadcast %cst_63 : f32 to vector<8x8xf32>
    %228 = arith.mulf %226, %227 : vector<8x8xf32>
    %229 = arith.addf %228, %5 : vector<8x8xf32>
    %cst_64 = arith.constant dense<0xFF800000> : vector<8xf32>
    %230 = vector.multi_reduction <maximumf>, %229, %cst_64 [1] : vector<8x8xf32> to vector<8xf32>
    %231 = vector.shape_cast %230 : vector<8xf32> to vector<8x1xf32>
    %232 = vector.broadcast %231 : vector<8x1xf32> to vector<8x8xf32>
    %233 = arith.subf %229, %232 : vector<8x8xf32>
    %234 = math.exp %233 : vector<8x8xf32>
    %cst_65 = arith.constant dense<0.000000e+00> : vector<8xf32>
    %235 = vector.multi_reduction <add>, %234, %cst_65 [1] : vector<8x8xf32> to vector<8xf32>
    %236 = vector.shape_cast %235 : vector<8xf32> to vector<8x1xf32>
    %237 = tpu.reciprocal %236 : vector<8x1xf32> -> vector<8x1xf32>
    %238 = vector.broadcast %237 : vector<8x1xf32> to vector<8x8xf32>
    %239 = arith.mulf %234, %238 : vector<8x8xf32>
    %240 = arith.addf %182, %239 : vector<8x8xf32>
    %cst_66 = arith.constant dense<0.000000e+00> : vector<8x8xf32>
    %241 = tpu.matmul %239, %186, %cst_66 {dimension_numbers = #tpu.dot_dimension_numbers<[1], [0], [0], [1], [0, 0, 1, 1], [], []>} : vector<8x8xf32>, vector<8x8xf32>, vector<8x8xf32> -> vector<8x8xf32>
    %242 = tpu.concatenate %67, %125, %183, %241 in 1 : vector<8x8xf32>, vector<8x8xf32>, vector<8x8xf32>, vector<8x8xf32> -> vector<8x32xf32>
    %c0_67 = arith.constant 0 : index
    %c0_68 = arith.constant 0 : index
    %c0_69 = arith.constant 0 : index
    %243 = vector.load %arg6[%c0_67, %c0_68, %c0_69] : memref<1x8x32xf32, #tpu.memory_space<vmem>>, vector<1x8x32xf32>
    %244 = vector.shape_cast %243 : vector<1x8x32xf32> to vector<8x32xf32>
    %245 = vector.shape_cast %242 : vector<8x32xf32> to vector<1x8x32xf32>
    tpu.vector_store %arg6[%c0_67, %c0_68, %c0_69], %245 {strides = array<i32>} : memref<1x8x32xf32, #tpu.memory_space<vmem>>, vector<1x8x32xf32>,
    %cst_70 = arith.constant 2.500000e-01 : f32
    %246 = vector.broadcast %cst_70 : f32 to vector<8x8xf32>
    %247 = arith.mulf %240, %246 : vector<8x8xf32>
    %c0_71 = arith.constant 0 : index
    %c0_72 = arith.constant 0 : index
    %c0_73 = arith.constant 0 : index
    %248 = vector.load %arg7[%c0_71, %c0_72, %c0_73] : memref<1x8x8xf32, #tpu.memory_space<vmem>>, vector<1x8x8xf32>
    %249 = vector.shape_cast %248 : vector<1x8x8xf32> to vector<8x8xf32>
    %250 = vector.shape_cast %247 : vector<8x8xf32> to vector<1x8x8xf32>
    tpu.vector_store %arg7[%c0_71, %c0_72, %c0_73], %250 {strides = array<i32>} : memref<1x8x8xf32, #tpu.memory_space<vmem>>, vector<1x8x8xf32>,
    return
  }
  func.func @transform_0(%arg0: i32) -> (i32, i32, i32) {
    %c0_i32 = arith.constant 0 : i32
    %c0_i32_0 = arith.constant 0 : i32
    %c0_i32_1 = arith.constant 0 : i32
    return %arg0, %c0_i32, %c0_i32_0 : i32, i32, i32
  }
  func.func @transform_1(%arg0: i32) -> (i32, i32) {
    %c0_i32 = arith.constant 0 : i32
    %c0_i32_0 = arith.constant 0 : i32
    %c0_i32_1 = arith.constant 0 : i32
    return %c0_i32, %c0_i32_0 : i32, i32
  }
  func.func @transform_2(%arg0: i32) -> (i32, i32) {
    %c0_i32 = arith.constant 0 : i32
    %c0_i32_0 = arith.constant 0 : i32
    %c0_i32_1 = arith.constant 0 : i32
    return %c0_i32, %c0_i32_0 : i32, i32
  }
  func.func @transform_3(%arg0: i32) -> (i32, i32) {
    %c0_i32 = arith.constant 0 : i32
    %c0_i32_0 = arith.constant 0 : i32
    %c0_i32_1 = arith.constant 0 : i32
    return %c0_i32, %c0_i32_0 : i32, i32
  }
  func.func @transform_4(%arg0: i32) -> (i32, i32) {
    %c0_i32 = arith.constant 0 : i32
    %c0_i32_0 = arith.constant 0 : i32
    %c0_i32_1 = arith.constant 0 : i32
    return %c0_i32, %c0_i32_0 : i32, i32
  }
  func.func @transform_5(%arg0: i32) -> (i32, i32, i32) {
    %c0_i32 = arith.constant 0 : i32
    %c0_i32_0 = arith.constant 0 : i32
    %c0_i32_1 = arith.constant 0 : i32
    return %arg0, %c0_i32, %c0_i32_0 : i32, i32, i32
  }
  func.func @transform_6(%arg0: i32) -> (i32, i32, i32) {
    %c0_i32 = arith.constant 0 : i32
    %c0_i32_0 = arith.constant 0 : i32
    %c0_i32_1 = arith.constant 0 : i32
    return %arg0, %c0_i32, %c0_i32_0 : i32, i32, i32
  }
}

</mosaic_0001>

<bundles_post_ra>
// kernel: protected_mha_forward.7
= control target key start
LH: loop header
LB: loop body
LE: loop exit
PB: predicated region body
PF: predicated region fallthrough
CT: control target
= control target key end

     0   :  { %vm26_vm0 = vcmask 261120   ;;  %s239_s1 = inlined_call_operand.vmem [shape: f32[32,32], index: 1, kind: input, shape index: {}]   ;;  %s240_s0 = inlined_call_operand.vmem [shape: f32[16,32], index: 0, kind: input, shape index: {}]   ;;  %s241_s2 = inlined_call_operand.vmem [shape: f32[1,32], index: 2, kind: input, shape index: {}]   ;;  %s242_s3 = inlined_call_operand.vmem [shape: f32[16,32], index: 3, kind: output, shape index: {}]  }
   0x1   :  { %v31_v0 = vld [vmem:[%s239_s1] sm:$0xff]  ;;  %v32_v1 = vld [vmem:[%s239_s1 + $0x8] sm:$0xff]  ;;  %vm171_vm1 = vmpackc.low %vm26_vm0, %vm26_vm0 }
   0x2   :  { %v170_v2 = vpack.c.bf16 %v32_v1, %v31_v0  ;;  %v33_v3 = vld [vmem:[%s239_s1 + $0x10] sm:$0xff]  ;;  %v34_v4 = vld [vmem:[%s239_s1 + $0x18] sm:$0xff]  ;;  %v29_v5 = vld [vmem:[%s240_s0] sm:$0xff] }
   0x3   :  { %v176_v6 = vpack.c.bf16 %v34_v4, %v33_v3  ;;  %167 = vmatprep.mubr.msk.f32.mxu0 %vm26_vm0, %v29_v5  ;;  %v146_v7 = vld [vmem:[%s241_s2] ss:$0 sm:$0xff]  ;;  %v30_v8 = vld [vmem:[%s240_s0 + $0x8] sm:$0xff] }
   0x4   :  { %172 = vmatprep.subr.msk.bf16.mxu0 %vm171_vm1, %v170_v2  ;;  %28 = vst.msk [vmem:[#allocation2 + $0x8] sm:$0xff] %vm26_vm0, %v146_v7  ;;  %27 = vst.msk [vmem:[#allocation2] sm:$0xff] %vm26_vm0, %v146_v7 }
   0x5   :  { %175 = vmatpush3.bf16.xpose.msk.msra.mxu0 %vm171_vm1, %v170_v2 }
   0x6   :  { %178 = vmatprep.subr.msk.bf16.mxu0 %vm171_vm1, %v176_v6 }
   0xb   :  { %v36_v9 = vld [vmem:[#allocation2 + $0x8] sm:$0xff]  ;;  %v35_v10 = vld [vmem:[#allocation2] sm:$0xff] }
   0xd   :  { %181 = vmatpush3.bf16.xpose.msk.msra.mxu0 %vm171_vm1, %v176_v6 }
  0x14   :  { %168 = vmatmul.mubr.msk.f32.vlgmr.msra.gmra.mrb[0].mxu0 %vm26_vm0, %v30_v8 }
  0xe7   :  { %v169_v11 = vpop.f32.mrb[0].mxu0 }
  0xe8   :  { %v132_v12 = vadd.f32 %v169_v11, %v36_v9  ;;  %v122_v13 = vpop.f32.mrb[1].mxu0 }
  0xe9   :  { %v131_v14 = vadd.f32 %v122_v13, %v35_v10 }
  0xea   :  { %134 = vst.msk [vmem:[#allocation2 + $0x8] sm:$0xff] %vm26_vm0, %v132_v12 }
  0xeb   :  { %133 = vst.msk [vmem:[#allocation2] sm:$0xff] %vm26_vm0, %v131_v14 }
  0xf1   :  { %v139_v15 = vld [vmem:[#allocation2 + $0x8] sm:$0xff] }
  0xf2   :  { %141 = vst.msk [vmem:[%s242_s3 + $0x8] sm:$0xff] %vm26_vm0, %v139_v15  ;;  %v138_v16 = vld [vmem:[#allocation2] sm:$0xff] }
  0xf3   :  { %140 = vst.msk [vmem:[%s242_s3] sm:$0xff] %vm26_vm0, %v138_v16 }

// kernel: protected_mha_forward.4
= control target key start
LH: loop header
LB: loop body
LE: loop exit
PB: predicated region body
PF: predicated region fallthrough
CT: control target
= control target key end

     0   :  { %vm45_vm0 = vcmask 261120   ;;  %vm26_vm2 = vcmask 785408   ;;  %s380_s1 = inlined_call_operand.vmem [shape: f32[96,32], index: 1, kind: input, shape index: {}]   ;;  %s381_s0 = inlined_call_operand.vmem [shape: f32[16,32], index: 0, kind: input, shape index: {}]   ;;  %s382_s2 = inlined_call_operand.vmem [shape: f32[1,96], index: 2, kind: input, shape index: {}]   ;;  %s383_s3 = inlined_call_operand.vmem [shape: f32[16,96], index: 3, kind: output, shape index: {}]  }
   0x1   :  { %v31_v0 = vld [vmem:[%s380_s1] sm:$0xff]  ;;  %v32_v1 = vld [vmem:[%s380_s1 + $0x8] sm:$0xff]  ;;  %vm299_vm1 = vmpackc.low %vm45_vm0, %vm45_vm0 }
   0x2   :  { %v235_v3 = vpack.c.bf16 %v32_v1, %v31_v0  ;;  %v33_v4 = vld [vmem:[%s380_s1 + $0x10] sm:$0xff]  ;;  %v34_v5 = vld [vmem:[%s380_s1 + $0x18] sm:$0xff]  ;;  %v29_v7 = vld [vmem:[%s381_s0] sm:$0xff] }
   0x3   :  { %v241_v6 = vpack.c.bf16 %v34_v5, %v33_v4  ;;  %232 = vmatprep.mubr.msk.f32.mxu0 %vm45_vm0, %v29_v7  ;;  %v179_v8 = vld [vmem:[%s382_s2] ss:$0 sm:$0xff]  ;;  %v36_v10 = vld [vmem:[%s380_s1 + $0x28] sm:$0xff]  ;;  %v37_v12 = vld [vmem:[%s380_s1 + $0x30] sm:$0xff] }
   0x4   :  { %237 = vmatprep.subr.msk.bf16.mxu0 %vm299_vm1, %v235_v3  ;;  %v35_v9 = vld [vmem:[%s380_s1 + $0x20] sm:$0xff]  ;;  %28 = vst.msk [vmem:[#allocation2 + $0x8] sm:$0xff] %vm26_vm2, %v179_v8  ;;  %27 = vst.msk [vmem:[#allocation2] sm:$0xff] %vm26_vm2, %v179_v8  ;;  %v38_v13 = vld [vmem:[%s380_s1 + $0x38] sm:$0xff] }
   0x5   :  { %240 = vmatpush3.bf16.xpose.msk.msra.mxu0 %vm299_vm1, %v235_v3  ;;  %v247_v11 = vpack.c.bf16 %v36_v10, %v35_v9  ;;  %v253_v14 = vpack.c.bf16 %v38_v13, %v37_v12  ;;  %v39_v15 = vld [vmem:[%s380_s1 + $0x40] sm:$0xff]  ;;  %v40_v16 = vld [vmem:[%s380_s1 + $0x48] sm:$0xff]  ;;  %v41_v18 = vld [vmem:[%s380_s1 + $0x50] sm:$0xff] }
   0x6   :  { %243 = vmatprep.subr.msk.bf16.mxu0 %vm299_vm1, %v241_v6  ;;  %v259_v17 = vpack.c.bf16 %v40_v16, %v39_v15  ;;  %v42_v19 = vld [vmem:[%s380_s1 + $0x58] sm:$0xff]  ;;  %v30_v21 = vld [vmem:[%s381_s0 + $0x8] sm:$0xff] }
   0x7   :  { %v265_v20 = vpack.c.bf16 %v42_v19, %v41_v18 }
   0xb   :  { %v44_v22 = vld [vmem:[#allocation2 + $0x8] sm:$0xff]  ;;  %v43_v23 = vld [vmem:[#allocation2] sm:$0xff] }
   0xd   :  { %246 = vmatpush3.bf16.xpose.msk.msra.mxu0 %vm299_vm1, %v241_v6 }
   0xe   :  { %249 = vmatprep.subr.msk.bf16.mxu0 %vm299_vm1, %v247_v11 }
  0x15   :  { %252 = vmatpush3.bf16.xpose.msk.msra.mxu0 %vm299_vm1, %v247_v11 }
  0x16   :  { %255 = vmatprep.subr.msk.bf16.mxu0 %vm299_vm1, %v253_v14 }
  0x1d   :  { %258 = vmatpush3.bf16.xpose.msk.msra.mxu0 %vm299_vm1, %v253_v14 }
  0x1e   :  { %261 = vmatprep.subr.msk.bf16.mxu0 %vm299_vm1, %v259_v17 }
  0x25   :  { %264 = vmatpush3.bf16.xpose.msk.msra.mxu0 %vm299_vm1, %v259_v17 }
  0x26   :  { %267 = vmatprep.subr.msk.bf16.mxu0 %vm299_vm1, %v265_v20 }
  0x2d   :  { %270 = vmatpush3.bf16.xpose.msk.msra.mxu0 %vm299_vm1, %v265_v20 }
  0x34   :  { %233 = vmatmul.mubr.msk.f32.vlgmr.msra.gmra.mrb[0].mxu0 %vm45_vm0, %v30_v21 }
 0x107   :  { %v234_v24 = vpop.f32.mrb[0].mxu0 }
 0x108   :  { %v164_v25 = vadd.f32 %v234_v24, %v44_v22  ;;  %v154_v26 = vpop.f32.mrb[1].mxu0 }
 0x109   :  { %v163_v27 = vadd.f32 %v154_v26, %v43_v23 }
 0x10a   :  { %167 = vst.msk [vmem:[#allocation2 + $0x8] sm:$0xff] %vm26_vm2, %v164_v25 }
 0x10b   :  { %166 = vst.msk [vmem:[#allocation2] sm:$0xff] %vm26_vm2, %v163_v27 }
 0x111   :  { %v172_v28 = vld [vmem:[#allocation2 + $0x8] sm:$0xff] }
 0x112   :  { %174 = vst.msk [vmem:[%s383_s3 + $0x8] sm:$0xff] %vm26_vm2, %v172_v28  ;;  %v171_v29 = vld [vmem:[#allocation2] sm:$0xff] }
 0x113   :  { %173 = vst.msk [vmem:[%s383_s3] sm:$0xff] %vm26_vm2, %v171_v29 }

// kernel: protected_mha_forward.5
= control target key start
LH: loop header
LB: loop body
LE: loop exit
PB: predicated region body
PF: predicated region fallthrough
CT: control target
= control target key end

     0   :  { %vm26_vm0 = vcmask 261120   ;;  %v164_v0 = vmov 0.0|0.0   ;;  %vm165_vm2 = vmmov 0   ;;  %v166_v3 = vmov 0.0   ;;  %s214_s1 = inlined_call_operand.vmem [shape: f32[32,32], index: 1, kind: input, shape index: {}]   ;;  %s215_s2 = inlined_call_operand.vmem [shape: f32[1,32], index: 2, kind: input, shape index: {}]   ;;  %s216_s0 = inlined_call_operand.vmem [shape: f32[8,32], index: 0, kind: input, shape index: {}]   ;;  %s217_s3 = inlined_call_operand.vmem [shape: f32[8,32], index: 3, kind: output, shape index: {}]  }
   0x1   :  { %153 = vmatprep.subr.bf16.mxu0 %v164_v0  ;;  %v29_v1 = vld [vmem:[%s214_s1] sm:$0xff]  ;;  %v30_v2 = vld [vmem:[%s214_s1 + $0x8] sm:$0xff]  ;;  %vm155_vm1 = vmpackc.low %vm26_vm0, %vm26_vm0  ;;  %150 = vmatprep.mubr.msk.f32.mxu0 %vm165_vm2, %v166_v3 }
   0x2   :  { %v154_v4 = vpack.c.bf16 %v30_v2, %v29_v1  ;;  %v131_v5 = vld [vmem:[%s215_s2] ss:$0 sm:$0xff]  ;;  %v31_v6 = vld [vmem:[%s214_s1 + $0x10] sm:$0xff]  ;;  %v32_v7 = vld [vmem:[%s214_s1 + $0x18] sm:$0xff] }
   0x3   :  { %27 = vst.msk [vmem:[#allocation2] sm:$0xff] %vm26_vm0, %v131_v5  ;;  %v158_v8 = vpack.c.bf16 %v32_v7, %v31_v6  ;;  %v28_v9 = vld [vmem:[%s216_s0] sm:$0xff] }
   0x4   :  { %156 = vmatpush3.bf16.xpose.msk.msra.mxu0 %vm155_vm1, %v154_v4 }
   0x5   :  { %157 = vmatprep.subr.bf16.mxu0 %v164_v0 }
   0xa   :  { %v33_v10 = vld [vmem:[#allocation2] sm:$0xff] }
   0xc   :  { %160 = vmatpush3.bf16.xpose.msk.msra.mxu0 %vm155_vm1, %v158_v8 }
  0x13   :  { %151 = vmatmul.mubr.msk.f32.vlgmr.msra.gmra.mrb[0].mxu0 %vm26_vm0, %v28_v9 }
  0xe6   :  { %v116_v11 = vpop.f32.mrb[0].mxu0 }
  0xe7   :  { %v120_v12 = vadd.f32 %v116_v11, %v33_v10  ;;  %v152_v13 = vpop.f32.mrb[1].mxu0 }
  0xe9   :  { %121 = vst.msk [vmem:[#allocation2] sm:$0xff] %vm26_vm0, %v120_v12 }
  0xf0   :  { %v125_v14 = vld [vmem:[#allocation2] sm:$0xff] }
  0xf1   :  { %126 = vst.msk [vmem:[%s217_s3] sm:$0xff] %vm26_vm0, %v125_v14 }

// kernel: protected_mha_forward.6
= control target key start
LH: loop header
LB: loop body
LE: loop exit
PB: predicated region body
PF: predicated region fallthrough
CT: control target
= control target key end

     0   :  { %12 = vsyncpa [#allocation3], 0  ;;  %s2125_s0 = inlined_call_operand.vmem [shape: f32[2,8,96], index: 0, kind: input, shape index: {}]   ;;  %s2126_s1 = inlined_call_operand.vmem [shape: f32[8,32], index: 1, kind: input, shape index: {}]   ;;  %s2127_s2 = inlined_call_operand.vmem [shape: f32[1,32], index: 2, kind: input, shape index: {}]   ;;  %s2128_s3 = inlined_call_operand.vmem [shape: f32[1,32], index: 3, kind: input, shape index: {}]   ;;  %s2129_s4 = inlined_call_operand.vmem [shape: f32[8,8], index: 4, kind: input, shape index: {}]   ;;  %s2130_s5 = inlined_call_operand.vmem [shape: f32[2,8,32], index: 5, kind: output, shape index: {0}]   ;;  %s2131_s6 = inlined_call_operand.hbm [shape: f32[2,8,8], index: 6, kind: output, shape index: {1}]  }
   0x1   :  { %14 = vsyncpa [#allocation3 + $0x1], 0  ;;  %s1823_s21 = smov 0   ;;  %s1825_s22 = smov 0  }
   0x2   :  { %s1827_s23 = smov 0   ;;  %s1829_s24 = smov 0  }
   0x3 LB: > { %s1844_s25 = sadd.s32 4294967295, %s1763_s24   ;;  %s1507_s26 = sadd.s32 4294967294, %s1763_s24   ;;  %s1763_s24 = sphi %s1829_s24, %s2139_s24   ;;  %s1759_s23 = sphi %s1827_s23, %s2138_s23   ;;  %s1755_s22 = sphi %s1825_s22, %s2137_s22   ;;  %s1751_s21 = sphi %s1823_s21, %s2136_s21  }
   0x4   : > { %s1848_s27 = sadd.s32 1, %s1763_s24   ;;  %s163_s28 = sadd.s32 1, %s1759_s23 }
   0x5   : > { %s160_s29 = ssub.s32 %s1763_s24, %s1848_s27  ;;  %p173_p0 = scmp.ne.s32.totalorder %s1759_s23, %s1755_s22 }
   0x6   : > { %p161_p1 = scmp.eq.s32.totalorder %s160_s29, 0  ;;  %p174_p2 = scmp.eq.s32.totalorder %s1844_s25, 1 }
   0x7   : > { %p179_p3 = scmp.ne.s32.totalorder %s1755_s22, %s1751_s21  ;;  %p180_p4 = scmp.eq.s32.totalorder %s1507_s26, 1 }
   0x8   : > { %s1859_s30 = scalar_select %p161_p1, %s1759_s23, %s163_s28  }
   0x9   : > { %p1861_p5 = por %p174_p2, %p173_p0  ;;  %p1865_p6 = por %p180_p4, %p179_p3 }
   0xa   : > { %p1510_p7 = scmp.ge.s32.totalorder %s1763_s24, 1  ;;  %p217_p8 = scmp.lt.s32.totalorder %s1763_s24, 3 }
   0xc   : > { %p218_p9 = pnand %p1510_p7, %p217_p8 }
   0xd   : > { %v1874_v0 = vld [vmem:[%s2126_s1] sm:$0xff] (!%p218_p9)  ;;  %vm280_vm0 = vcmask (!%p218_p9), 64512   ;;  %p250_p10 = scmp.lt.s32.totalorder (!%p218_p9), %s1844_s25, 1  ;;  %v1765_v1 = vmov (!%p218_p9), 0.0   ;;  %vm1766_vm1 = vmmov (!%p218_p9), 0   ;;  %s1767_s18 = smov (!%p218_p9), 96   ;;  %v263_v10 = vlaneseq (!%p218_p9) }
   0xe   : > { %221 = sbr.rel (%p218_p9) target bundleno = 2944 (0xb80), region = 40  ;;  %1564 = vmatprep.subr.mxu0 (!%p218_p9), %v1765_v1  ;;  %1566 = vmatprep.mubr.msk.f32.mxu0 (!%p218_p9), %vm1766_vm1, %v1765_v1  ;;  %v1515_v2 = vld [vmem:[%s2128_s3] ss:$0 sm:$0xff] (!%p218_p9)  ;;  %s1768_s26 = smov (!%p218_p9), 7   ;;  %vm364_vm2 = vcmask (!%p218_p9), 56320   ;;  %vm376_vm4 = vcmask (!%p218_p9), 48128  }
   0xf   : > { %1565 = vmatpush3.xpose.msk.msra.mxu0 (!%p218_p9), %vm280_vm0, %v1874_v0  ;;  %1569 = vmatprep.subr.mxu1 (!%p218_p9), %v1765_v1  ;;  %v1514_v6 = vld [vmem:[%s2127_s2] ss:$0 sm:$0xff] (!%p218_p9)  ;;  %s1769_s28 = smov (!%p218_p9), 127   ;;  %v264_v11 = vshrl.u32 (!%p218_p9), %v263_v10, 7  ;;  %s1770_s29 = smov (!%p218_p9), 6   ;;  %vm389_vm6 = vcmask (!%p218_p9), 31744  }
  0x10   : > { %1571 = vmatprep.mubr.msk.f32.mxu1 (!%p218_p9), %vm1766_vm1, %v1765_v1  ;;  %1574 = vmatprep.subr.mxu0 (!%p218_p9), %v1765_v1  ;;  %s1771_s9 = smov (!%p218_p9), 126   ;;  %s1772_s10 = smov (!%p218_p9), 4   ;;  %v1950_v35 = vld [vmem:[%s2129_s4] sm:$0xff] (!%p218_p9) }
  0x11   : > { %v265_v12 = vsub.s32 (!%p218_p9), 7, %v264_v11  ;;  %s1773_s13 = smov (!%p218_p9), 124   ;;  %s1774_s14 = smov (!%p218_p9), 120  }
  0x12   : > { %s1777_s19 = smov (!%p218_p9), 112   ;;  %s1778_s20 = smov (!%p218_p9), 56  }
  0x13   : > { %v366_v13 = vand.u32 (!%p218_p9), 1, %v265_v12  ;;  %v378_v19 = vshra.s32 (!%p218_p9), %v265_v12, 1  ;;  %v391_v27 = vshra.s32 (!%p218_p9), %v265_v12, 2  ;;  %s1780_s15 = smov (!%p218_p9), 104   ;;  %s1781_s16 = smov (!%p218_p9), 72  }
  0x15   : > { %s1883_s11 = scalar_select %p250_p10, %s1844_s25, 1  ;;  %vm1922_vm3 = vcmp.eq.s32.totalorder %v366_v13, 1  ;;  %v1931_v22 = vand.u32 1, %v378_v19  ;;  %v1941_v28 = vand.u32 1, %v391_v27 }
  0x17   : > { %s1512_s12 = sshll.u32 %s1883_s11, 3  ;;  %vm380_vm5 = vcmp.eq.s32.totalorder %v1931_v22, 1  ;;  %vm393_vm7 = vcmp.eq.s32.totalorder %v1941_v28, 1 }
  0x18   : > { %s253_s17 = scalar_lea.vmem %s2125_s0, %s1512_s12 }
  0x19   : > { %v1898_v3 = vld [vmem:[%s253_s17] sm:$0xff]  ;;  %s1775_s17 = smov 88  }
  0x1a   : > { %v1901_v4 = vadd.f32 %v1515_v2, %v1898_v3  ;;  %396 = vrot.lane.b32.xlu0 %v1898_v3, %s1767_s18  ;;  %v1914_v7 = vadd.f32 %v1514_v6, %v1898_v3  ;;  %s1776_s18 = smov 64  }
  0x1c   : > { %1567 = vmatmul.mubr.msk.f32.vlgmr.msra.gmra.mrb[0].mxu0 %vm280_vm0, %v1901_v4 }
  0x1d   : > { %1576 = vmatprep.mubr.msk.f32.mxu0 %vm1766_vm1, %v1765_v1 }
  0x8c   : > { %v397_v5 = vpop.permute.xlu0 %396 }
  0x8d   : > { %1570 = vmatpush3.xpose.msk.msra.mxu1 %vm280_vm0, %v397_v5 }
  0x8e   : > { %1579 = vmatprep.subr.mxu1 %v1765_v1 }
  0x90   : > { %1572 = vmatmul.mubr.msk.f32.vlgmr.msra.gmra.mrb[0].mxu1 %vm280_vm0, %v1914_v7 }
  0x91   : > { %1581 = vmatprep.mubr.msk.f32.mxu1 %vm1766_vm1, %v1765_v1 }
  0xef   : > { %v353_v8 = vpop.f32.mrb[0].mxu0 }
  0xf0   : > { %361 = vrot.lane.b32.xlu1 %v353_v8, %s1768_s26  ;;  %358 = vrot.lane.b32.xlu0 %v353_v8, %s1769_s28  ;;  %v1568_v9 = vpop.f32.mrb[1].mxu0 }
 0x162   : > { %v362_v15 = vpop.permute.xlu1 %361  ;;  %v359_v16 = vpop.permute.xlu0 %358 }
 0x163   : > { %v365_v17 = vsel %vm364_vm2, %v359_v16, %v362_v15  ;;  %v469_v20 = vpop.f32.mrb[0].mxu1 }
 0x164   : > { %v368_v18 = vsel %vm1922_vm3, %v365_v17, %v353_v8  ;;  %v1573_v21 = vpop.f32.mrb[1].mxu1 }
 0x165   : > { %373 = vrot.lane.b32.xlu0 %v368_v18, %s1770_s29  ;;  %370 = vrot.lane.b32.xlu1 %v368_v18, %s1771_s9 }
 0x1d7   : > { %v374_v23 = vpop.permute.xlu0 %373  ;;  %v371_v24 = vpop.permute.xlu1 %370 }
 0x1d8   : > { %v377_v25 = vsel %vm376_vm4, %v371_v24, %v374_v23 }
 0x1d9   : > { %v381_v26 = vsel %vm380_vm5, %v377_v25, %v368_v18 }
 0x1da   : > { %386 = vrot.lane.b32.xlu0 %v381_v26, %s1772_s10  ;;  %383 = vrot.lane.b32.xlu1 %v381_v26, %s1773_s13 }
 0x1de   : > { %565 = vrot.lane.b32.xlu1 %v1874_v0, %s1774_s14  ;;  %563 = vrot.lane.b32.xlu0 %v1901_v4, %s1774_s14 }
 0x24c   : > { %v387_v29 = vpop.permute.xlu0 %386  ;;  %v384_v30 = vpop.permute.xlu1 %383 }
 0x24d   : > { %v390_v31 = vsel %vm389_vm6, %v384_v30, %v387_v29 }
 0x24e   : > { %v394_v32 = vsel %vm393_vm7, %v390_v31, %v381_v26 }
 0x24f   : > { %v470_v33 = vadd.f32 %v469_v20, %v394_v32 }
 0x250   : > { %v566_v34 = vpop.permute.xlu1 %565  ;;  %v564_v37 = vpop.permute.xlu0 %563 }
 0x251   : > { %v473_v36 = vmul.f32 0.35355338, %v470_v33  ;;  %1580 = vmatpush3.xpose.msk.msra.mxu1 %vm280_vm0, %v566_v34 }
 0x252   : > { %1589 = vmatprep.subr.mxu1 %v1765_v1 }
 0x253   : > { %v474_v38 = vadd.f32 %v473_v36, %v1950_v35 }
 0x254   : > { %1582 = vmatmul.mubr.msk.f32.vlgmr.msra.gmra.mrb[2].mxu1 %vm280_vm0, %v564_v37 }
 0x255   : > { %v475_v39 = vsel %vm280_vm0, %v474_v38, -inf  ;;  %1591 = vmatprep.mubr.msk.f32.mxu1 %vm1766_vm1, %v1765_v1 }
 0x256   : > { %476 = vmax.xlane.f32.xlu1 %v475_v39 }
 0x267   : > { %670 = vrot.lane.b32.xlu1 %v1898_v3, %s1775_s17  ;;  %s1782_s17 = smov 48  }
 0x26b   : > { %668 = vrot.lane.b32.xlu1 %v1914_v7, %s1774_s14  ;;  %s1779_s14 = smov 80  }
 0x2e3   : > { %v477_v40 = vpop.xlane.xlu1 %476 }
 0x2e4   : > { %v478_v41 = vsub.f32 %v474_v38, %v477_v40 }
 0x2e6   : > { %v479_v42 = vmul.f32 1.442695, %v478_v41 }
 0x2e7   : > { %v671_v49 = vpop.permute.xlu1 %670 }
 0x2e8   : > { %1685 = vpow2.f32 %v479_v42 }
 0x2eb   : > { %v669_v52 = vpop.permute.xlu1 %668 }
 0x2f2   : > { %v1686_v43 = vpop.eup %1685 }
 0x2f3   : > { %v481_v44 = vsel %vm280_vm0, %v1686_v43, 0.0 }
 0x2f4   : > { %482 = vadd.xlane.f32.xlu0 %v481_v44 }
 0x30a   : > { %487 = vrot.lane.b32.xlu0 %v1898_v3, %s1776_s18  ;;  %s1537_s18 = sshll.u32 %s1844_s25, 7 }
 0x327   : > { %v637_v45 = vpop.f32.mrb[2].mxu1 }
 0x328   : > { %645 = vrot.lane.b32.xlu1 %v637_v45, %s1768_s26  ;;  %642 = vrot.lane.b32.xlu0 %v637_v45, %s1769_s28  ;;  %v1583_v46 = vpop.f32.mrb[3].mxu1 }
 0x381   : > { %v483_v47 = vpop.xlane.xlu0 %482 }
 0x382   : > { %1687 = vrcp.f32 %v483_v47 }
 0x385   : > { %v488_v48 = vpop.permute.xlu0 %487 }
 0x386   : > { %1575 = vmatpush3.msra.mxu0 %v488_v48 }
 0x387   : > { %1584 = vmatprep.subr.mxu0 %v1765_v1 }
 0x38c   : > { %v1688_v50 = vpop.eup %1687 }
 0x38d   : > { %v1966_v51 = vmul.f32 %v1688_v50, %v1686_v43 }
 0x38f   : > { %1577 = vmatmul.mubr.msk.f32.vlgmr.msra.gmra.mrb[2].mxu0 %vm280_vm0, %v1966_v51 }
 0x390   : > { %1585 = vmatpush3.xpose.msk.msra.mxu0 %vm280_vm0, %v671_v49  ;;  %1586 = vmatprep.mubr.msk.f32.mxu0 %vm1766_vm1, %v1765_v1 }
 0x391   : > { %1594 = vmatprep.subr.mxu0 %v1765_v1 }
 0x393   : > { %1587 = vmatmul.mubr.msk.f32.vlgmr.msra.gmra.mrb[4].mxu0 %vm280_vm0, %v669_v52 }
 0x394   : > { %1596 = vmatprep.mubr.msk.f32.mxu0 %vm1766_vm1, %v1765_v1 }
 0x39a   : > { %v646_v53 = vpop.permute.xlu1 %645  ;;  %v643_v54 = vpop.permute.xlu0 %642 }
 0x39b   : > { %v648_v55 = vsel %vm364_vm2, %v643_v54, %v646_v53 }
 0x39c   : > { %v649_v56 = vsel %vm1922_vm3, %v648_v55, %v637_v45 }
 0x39d   : > { %654 = vrot.lane.b32.xlu1 %v649_v56, %s1770_s29  ;;  %651 = vrot.lane.b32.xlu0 %v649_v56, %s1771_s9 }
 0x40f   : > { %v655_v57 = vpop.permute.xlu1 %654  ;;  %v652_v58 = vpop.permute.xlu0 %651 }
 0x410   : > { %v657_v59 = vsel %vm376_vm4, %v652_v58, %v655_v57 }
 0x411   : > { %v658_v60 = vsel %vm380_vm5, %v657_v59, %v649_v56 }
 0x412   : > { %663 = vrot.lane.b32.xlu1 %v658_v60, %s1772_s10  ;;  %660 = vrot.lane.b32.xlu0 %v658_v60, %s1773_s13 }
 0x416   : > { %838 = vrot.lane.b32.xlu0 %v1874_v0, %s1777_s19  ;;  %836 = vrot.lane.b32.xlu1 %v1901_v4, %s1777_s19 }
 0x462   : > { %v1989_v61 = vpop.f32.mrb[2].mxu0 }
 0x463   : > { %v1578_v62 = vpop.f32.mrb[3].mxu0 }
 0x466   : > { %v742_v63 = vpop.f32.mrb[4].mxu0 }
 0x467   : > { %v1588_v2 = vpop.f32.mrb[5].mxu0 }
 0x484   : > { %v664_v5 = vpop.permute.xlu1 %663  ;;  %v661_v6 = vpop.permute.xlu0 %660 }
 0x485   : > { %v666_v8 = vsel %vm389_vm6, %v661_v6, %v664_v5 }
 0x486   : > { %v667_v9 = vsel %vm393_vm7, %v666_v8, %v658_v60 }
 0x487   : > { %v743_v10 = vadd.f32 %v742_v63, %v667_v9 }
 0x488   : > { %v839_v11 = vpop.permute.xlu0 %838  ;;  %v837_v12 = vpop.permute.xlu1 %836 }
 0x489   : > { %1595 = vmatpush3.xpose.msk.msra.mxu0 %vm280_vm0, %v839_v11  ;;  %v746_v13 = vmul.f32 0.35355338, %v743_v10 }
 0x48a   : > { %1604 = vmatprep.subr.mxu0 %v1765_v1 }
 0x48b   : > { %v747_v15 = vadd.f32 %v746_v13, %v1950_v35 }
 0x48c   : > { %1597 = vmatmul.mubr.msk.f32.vlgmr.msra.gmra.mrb[6].mxu0 %vm280_vm0, %v837_v12 }
 0x48d   : > { %v748_v16 = vsel %vm280_vm0, %v747_v15, -inf  ;;  %1606 = vmatprep.mubr.msk.f32.mxu0 %vm1766_vm1, %v1765_v1 }
 0x48e   : > { %749 = vmax.xlane.f32.xlu0 %v748_v16 }
 0x4a4   : > { %760 = vrot.lane.b32.xlu0 %v1898_v3, %s1778_s20 }
 0x4a8   : > { %941 = vrot.lane.b32.xlu0 %v1914_v7, %s1777_s19 }
 0x51b   : > { %v750_v17 = vpop.xlane.xlu0 %749 }
 0x51c   : > { %v751_v18 = vsub.f32 %v747_v15, %v750_v17 }
 0x51e   : > { %v752_v19 = vmul.f32 1.442695, %v751_v18 }
 0x51f   : > { %v761_v23 = vpop.permute.xlu0 %760 }
 0x520   : > { %1689 = vpow2.f32 %v752_v19  ;;  %1590 = vmatpush3.msra.mxu1 %v761_v23 }
 0x521   : > { %1599 = vmatprep.subr.mxu1 %v1765_v1 }
 0x523   : > { %v942_v31 = vpop.permute.xlu0 %941 }
 0x52a   : > { %v1690_v20 = vpop.eup %1689 }
 0x52b   : > { %v754_v21 = vsel %vm280_vm0, %v1690_v20, 0.0 }
 0x52c   : > { %755 = vadd.xlane.f32.xlu1 %v754_v21 }
 0x53d   : > { %943 = vrot.lane.b32.xlu1 %v1898_v3, %s1779_s14 }
 0x55f   : > { %v910_v24 = vpop.f32.mrb[6].mxu0 }
 0x560   : > { %918 = vrot.lane.b32.xlu0 %v910_v24, %s1768_s26  ;;  %v1598_v25 = vpop.f32.mrb[7].mxu0  ;;  %915 = vrot.lane.b32.xlu1 %v910_v24, %s1769_s28 }
 0x5b9   : > { %v756_v26 = vpop.xlane.xlu1 %755 }
 0x5ba   : > { %1691 = vrcp.f32 %v756_v26 }
 0x5bd   : > { %v944_v30 = vpop.permute.xlu1 %943 }
 0x5c4   : > { %v1692_v27 = vpop.eup %1691 }
 0x5c5   : > { %v2008_v29 = vmul.f32 %v1692_v27, %v1690_v20 }
 0x5c7   : > { %1592 = vmatmul.mubr.msk.f32.vlgmr.msra.gmra.mrb[4].mxu1 %vm280_vm0, %v2008_v29  ;;  %v759_v6 = vadd.f32 %v2008_v29, %v1966_v51 }
 0x5c8   : > { %1600 = vmatpush3.xpose.msk.msra.mxu1 %vm280_vm0, %v944_v30  ;;  %1601 = vmatprep.mubr.msk.f32.mxu1 %vm1766_vm1, %v1765_v1 }
 0x5c9   : > { %1609 = vmatprep.subr.mxu1 %v1765_v1 }
 0x5cb   : > { %1602 = vmatmul.mubr.msk.f32.vlgmr.msra.gmra.mrb[6].mxu1 %vm280_vm0, %v942_v31 }
 0x5cc   : > { %1611 = vmatprep.mubr.msk.f32.mxu1 %vm1766_vm1, %v1765_v1 }
 0x5d2   : > { %v916_v32 = vpop.permute.xlu1 %915  ;;  %v919_v33 = vpop.permute.xlu0 %918 }
 0x5d3   : > { %v921_v34 = vsel %vm364_vm2, %v916_v32, %v919_v33 }
 0x5d4   : > { %v922_v36 = vsel %vm1922_vm3, %v921_v34, %v910_v24 }
 0x5d5   : > { %927 = vrot.lane.b32.xlu0 %v922_v36, %s1770_s29  ;;  %924 = vrot.lane.b32.xlu1 %v922_v36, %s1771_s9 }
 0x647   : > { %v928_v37 = vpop.permute.xlu0 %927  ;;  %v925_v38 = vpop.permute.xlu1 %924 }
 0x648   : > { %v930_v39 = vsel %vm376_vm4, %v925_v38, %v928_v37 }
 0x649   : > { %v931_v40 = vsel %vm380_vm5, %v930_v39, %v922_v36 }
 0x64a   : > { %936 = vrot.lane.b32.xlu0 %v931_v40, %s1772_s10  ;;  %933 = vrot.lane.b32.xlu1 %v931_v40, %s1773_s13 }
 0x64e   : > { %1111 = vrot.lane.b32.xlu1 %v1874_v0, %s1780_s15  ;;  %1109 = vrot.lane.b32.xlu0 %v1901_v4, %s1780_s15 }
 0x69a   : > { %v2031_v41 = vpop.f32.mrb[4].mxu1 }
 0x69b   : > { %v1593_v42 = vpop.f32.mrb[5].mxu1 }
 0x69e   : > { %v1015_v43 = vpop.f32.mrb[6].mxu1 }
 0x69f   : > { %v1603_v44 = vpop.f32.mrb[7].mxu1 }
 0x6bc   : > { %v937_v45 = vpop.permute.xlu0 %936  ;;  %v934_v46 = vpop.permute.xlu1 %933 }
 0x6bd   : > { %v939_v47 = vsel %vm389_vm6, %v934_v46, %v937_v45 }
 0x6be   : > { %v940_v48 = vsel %vm393_vm7, %v939_v47, %v931_v40 }
 0x6bf   : > { %v1016_v49 = vadd.f32 %v1015_v43, %v940_v48 }
 0x6c0   : > { %v1112_v50 = vpop.permute.xlu1 %1111  ;;  %v1110_v52 = vpop.permute.xlu0 %1109 }
 0x6c1   : > { %1610 = vmatpush3.xpose.msk.msra.mxu1 %vm280_vm0, %v1112_v50  ;;  %v1019_v0 = vmul.f32 0.35355338, %v1016_v49 }
 0x6c2   : > { %1619 = vmatprep.subr.mxu1 %v1765_v1 }
 0x6c3   : > { %v1020_v4 = vadd.f32 %v1019_v0, %v1950_v35 }
 0x6c4   : > { %1612 = vmatmul.mubr.msk.f32.vlgmr.msra.gmra.mrb[8].mxu1 %vm280_vm0, %v1110_v52 }
 0x6c5   : > { %v1021_v53 = vsel %vm280_vm0, %v1020_v4, -inf  ;;  %1621 = vmatprep.mubr.msk.f32.mxu1 %vm1766_vm1, %v1765_v1 }
 0x6c6   : > { %1022 = vmax.xlane.f32.xlu1 %v1021_v53 }
 0x6d7   : > { %1216 = vrot.lane.b32.xlu1 %v1898_v3, %s1781_s16 }
 0x6db   : > { %1214 = vrot.lane.b32.xlu1 %v1914_v7, %s1780_s15  ;;  %s2082_s15 = scalar_lea.hbm %s2131_s6, %s1537_s18 }
 0x753   : > { %v1023_v54 = vpop.xlane.xlu1 %1022 }
 0x754   : > { %v1024_v55 = vsub.f32 %v1020_v4, %v1023_v54 }
 0x756   : > { %v1025_v56 = vmul.f32 1.442695, %v1024_v55 }
 0x757   : > { %v1217_v63 = vpop.permute.xlu1 %1216 }
 0x758   : > { %1693 = vpow2.f32 %v1025_v56 }
 0x75b   : > { %v1215_v9 = vpop.permute.xlu1 %1214 }
 0x762   : > { %v1694_v57 = vpop.eup %1693 }
 0x763   : > { %v1027_v58 = vsel %vm280_vm0, %v1694_v57, 0.0 }
 0x764   : > { %1028 = vadd.xlane.f32.xlu0 %v1027_v58 }
 0x77a   : > { %1033 = vrot.lane.b32.xlu0 %v1898_v3, %s1782_s17 }
 0x797   : > { %v1183_v59 = vpop.f32.mrb[8].mxu1 }
 0x798   : > { %1191 = vrot.lane.b32.xlu1 %v1183_v59, %s1768_s26  ;;  %1188 = vrot.lane.b32.xlu0 %v1183_v59, %s1769_s28  ;;  %v1613_v60 = vpop.f32.mrb[9].mxu1  ;;  %s1783_s26 = smov 40   ;;  %s1784_s28 = smov 16  }
 0x7f1   : > { %v1029_v62 = vpop.xlane.xlu0 %1028 }
 0x7f2   : > { %1695 = vrcp.f32 %v1029_v62 }
 0x7f5   : > { %v1034_v7 = vpop.permute.xlu0 %1033 }
 0x7f6   : > { %1605 = vmatpush3.msra.mxu0 %v1034_v7 }
 0x7f7   : > { %1614 = vmatprep.subr.mxu0 %v1765_v1 }
 0x7fc   : > { %v1696_v2 = vpop.eup %1695 }
 0x7fd   : > { %v1031_v5 = vmul.f32 %v1696_v2, %v1694_v57 }
 0x7ff   : > { %1607 = vmatmul.mubr.msk.f32.vlgmr.msra.gmra.mrb[8].mxu0 %vm280_vm0, %v1031_v5  ;;  %v1032_v8 = vadd.f32 %v1031_v5, %v759_v6 }
 0x800   : > { %1615 = vmatpush3.xpose.msk.msra.mxu0 %vm280_vm0, %v1217_v63  ;;  %1616 = vmatprep.mubr.msk.f32.mxu0 %vm1766_vm1, %v1765_v1 }
 0x803   : > { %1617 = vmatmul.mubr.msk.f32.vlgmr.msra.gmra.mrb[10].mxu0 %vm280_vm0, %v1215_v9 }
 0x80a   : > { %v1192_v10 = vpop.permute.xlu1 %1191  ;;  %v1189_v11 = vpop.permute.xlu0 %1188 }
 0x80b   : > { %v1194_v12 = vsel %vm364_vm2, %v1189_v11, %v1192_v10 }
 0x80c   : > { %v1195_v13 = vsel %vm1922_vm3, %v1194_v12, %v1183_v59 }
 0x80d   : > { %1200 = vrot.lane.b32.xlu1 %v1195_v13, %s1770_s29  ;;  %1197 = vrot.lane.b32.xlu0 %v1195_v13, %s1771_s9  ;;  %s1785_s29 = smov 8   ;;  %s247_s9 = sand.u32 1, %s1755_s22  }
 0x80e   : > { %s1408_s16 = scalar_lea.sflag [#allocation3], %s247_s9 }
 0x87f   : > { %v1201_v51 = vpop.permute.xlu1 %1200  ;;  %v1198_v15 = vpop.permute.xlu0 %1197 }
 0x880   : > { %v1203_v16 = vsel %vm376_vm4, %v1198_v15, %v1201_v51 }
 0x881   : > { %v1204_v1 = vsel %vm380_vm5, %v1203_v16, %v1195_v13 }
 0x882   : > { %1209 = vrot.lane.b32.xlu1 %v1204_v1, %s1772_s10  ;;  %1206 = vrot.lane.b32.xlu0 %v1204_v1, %s1773_s13  ;;  %s1511_s10 = sshll.u32 %s247_s9, 3 }
 0x883   : > { %s249_s13 = scalar_lea.vmem [#allocation2], %s1511_s10 }
 0x884   : > { %s1424_s19 = sshll.u32 %s249_s13, 4  ;;  %s1425_s19 = int_to_ptr.vmem [resolvable:$true] %s1424_s19 }
 0x885   : > { %s1701_s17 = scalar_lea.vmem %s1425_s19, 128 }
 0x886   : > { %p1702_p11 = scmp.ne.s32.totalorder %s1425_s19, %s1701_s17 }
 0x888   : > { %p1703_p12 = pnand %p1702_p11, %p1861_p5 }
 0x88a   : > { %p1704_p13 = pneg %p1703_p12 }
 0x8d2   : > { %v1105_v17 = vpop.f32.mrb[8].mxu0 }
 0x8d3   : > { %v1608_v18 = vpop.f32.mrb[9].mxu0 }
 0x8d6   : > { %v1288_v19 = vpop.f32.mrb[10].mxu0 }
 0x8d7   : > { %v1618_v14 = vpop.f32.mrb[11].mxu0 }
 0x8f4   : > { %v1210_v20 = vpop.permute.xlu1 %1209  ;;  %v1207_v21 = vpop.permute.xlu0 %1206 }
 0x8f5   : > { %v1212_v23 = vsel %vm389_vm6, %v1207_v21, %v1210_v20 }
 0x8f6   : > { %v1213_v24 = vsel %vm393_vm7, %v1212_v23, %v1204_v1 }
 0x8f7   : > { %v1289_v25 = vadd.f32 %v1288_v19, %v1213_v24 }
 0x8f9   : > { %v1292_v26 = vmul.f32 0.35355338, %v1289_v25 }
 0x8fb   : > { %v1293_v22 = vadd.f32 %v1292_v26, %v1950_v35 }
 0x8fd   : > { %v1294_v27 = vsel %vm280_vm0, %v1293_v22, -inf }
 0x8fe   : > { %1295 = vmax.xlane.f32.xlu0 %v1294_v27 }
 0x914   : > { %1306 = vrot.lane.b32.xlu0 %v1898_v3, %s1783_s26  ;;  %s1786_s26 = smov [#allocation2]  }
 0x918   : > { %1387 = vrot.lane.b32.xlu0 %v1105_v17, %s1784_s28  ;;  %s1705_s28 = sshll.u32 %s1786_s26, 4  ;;  %s1706_s28 = int_to_ptr.vmem [resolvable:$false] %s1705_s28 }
 0x919   : > { %p1708_p0 = scmp.lt.s32.totalorder %s1425_s19, %s1706_s28 }
 0x98b   : > { %v1296_v29 = vpop.xlane.xlu0 %1295 }
 0x98c   : > { %v1297_v30 = vsub.f32 %v1293_v22, %v1296_v29 }
 0x98e   : > { %v1298_v31 = vmul.f32 1.442695, %v1297_v30 }
 0x98f   : > { %v1307_v32 = vpop.permute.xlu0 %1306 }
 0x990   : > { %1697 = vpow2.f32 %v1298_v31  ;;  %1620 = vmatpush3.msra.mxu1 %v1307_v32 }
 0x99a   : > { %v1698_v28 = vpop.eup %1697 }
 0x99b   : > { %v1300_v33 = vsel %vm280_vm0, %v1698_v28, 0.0 }
 0x99c   : > { %1301 = vadd.xlane.f32.xlu1 %v1300_v33 }
 0x9ad   : > { %1383 = vrot.lane.b32.xlu1 %v2031_v41, %s1785_s29  ;;  %s1707_s29 = scalar_lea.vmem %s1706_s28, 256 }
 0x9ae   : > { %p1709_p1 = scmp.lt.s32.totalorder %s1707_s29, %s1701_s17 }
 0x9b0   : > { %p1710_p2 = por %p1709_p1, %p1708_p0 }
 0x9b2   : > { %p1711_p3 = pnand %p1710_p2, %p1704_p13 }
 0xa29   : > { %v1302_v35 = vpop.xlane.xlu1 %1301 }
 0xa2a   : > { %1699 = vrcp.f32 %v1302_v35 }
 0xa34   : > { %v1700_v3 = vpop.eup %1699 }
 0xa35   : > { %v1304_v34 = vmul.f32 %v1700_v3, %v1698_v28 }
 0xa37   : > { %1622 = vmatmul.mubr.msk.f32.vlgmr.msra.gmra.mrb[10].mxu1 %vm280_vm0, %v1304_v34  ;;  %v1305_v36 = vadd.f32 %v1304_v34, %v1032_v8 }
 0xa39   : > { %v1401_v37 = vmul.f32 0.25, %v1305_v36 }
 0xa3b   : > { %1402 = vst.msk [vmem:[%s249_s13] sm:$0xff] %vm280_vm0, %v1401_v37 }
 0xa3c   : > { %1714 = shalt.err (!%p1711_p3)
}
 0xa3d   : > { %s1715_s25 = scalar_lea.hbm %s2082_s15, 128  ;;  %s1719_s13 = scalar_lea.hbm %s2131_s6, 256 }
 0xa3e   : > { %p1716_p4 = scmp.ne.s32.totalorder %s2082_s15, %s1715_s25  ;;  %p1720_p9 = scmp.lt.u32.totalorder %s2082_s15, %s2131_s6 }
 0xa3f   : > { %p1721_p10 = scmp.lt.u32.totalorder %s1719_s13, %s1715_s25  ;;  %p1723_p12 = scmp.lt.u32.totalorder %s1715_s25, %s2082_s15 }
 0xa40   : > { %p1717_p7 = pnand %p1716_p4, %p1861_p5 }
 0xa41   : > { %p1722_p11 = por %p1721_p10, %p1720_p9 }
 0xa42   : > { %p1718_p8 = pneg %p1717_p7 }
 0xa43   : > { %p1724_p13 = por %p1723_p12, %p1722_p11 }
 0xa45   : > { %p1725_p0 = pnand %p1724_p13, %p1718_p8 }
 0xa47   : > { %1728 = shalt.err (!%p1725_p0)
}
 0xa48   : > { %1624 = dma.vmem_to_hbm [thread:$0]  (%p1861_p5), %s1425_s19, 128, %s2082_s15, %s1408_s16   ;;  %v1384_v40 = vpop.permute.xlu1 %1383  ;;  %vm1395_vm8 = vcmask 130048   ;;  %vm1397_vm9 = vcmask 195584   ;;  %v1388_v42 = vpop.permute.xlu0 %1387  ;;  %vm1399_vm10 = vcmask 261120  }
 0xa49   : > { %s1787_s14 = smov 24   ;;  %v1394_v41 = vsel %vm280_vm0, %v1989_v61, %v1384_v40  ;;  %s257_s28 = scalar_lea.vmem %s2130_s5, %s1512_s12 }
 0xa4a   : > { %v1396_v43 = vsel %vm1395_vm8, %v1394_v41, %v1388_v42 }
 0xb0a   : > { %v1378_v38 = vpop.f32.mrb[10].mxu1 }
 0xb0b   : > { %1391 = vrot.lane.b32.xlu1 %v1378_v38, %s1787_s14  ;;  %v1623_v39 = vpop.f32.mrb[11].mxu1 }
 0xb7d   : > { %v1392_v44 = vpop.permute.xlu1 %1391 }
 0xb7e   : > { %v1398_v45 = vsel %vm1397_vm9, %v1396_v43, %v1392_v44 }
 0xb7f   : > { %1400 = vst.msk [vmem:[%s257_s28] sm:$0xff] %vm1399_vm10, %v1398_v45 }
 0xb80 PF: > { %p1630_p5 = scmp.ge.s32.totalorder %s1763_s24, 2  ;;  %s1443_s7 = sand.u32 1, %s1751_s21  }
 0xb81   : > { %s1444_s19 = scalar_lea.sflag [#allocation3], %s1443_s7 }
 0xb82   : > { %p1627_p1 = pnand %p1630_p5, %p1865_p6 }
 0xb84   : > { %1746 = dma.done.wait (!%p1627_p1), %s1444_s19, 128  }
 0xb85   : > { %1748 = vsyncadd (!%p1627_p1), %s1444_s19, 4294967168  ;;  %p17_p2 = scmp.ge.s32.totalorder %s1848_s27, 4   ;;  %s2136_s21 = smov %s1755_s22 }
 0xb86   : > { %s2137_s22 = smov %s1759_s23  ;;  %s2138_s23 = smov %s1859_s30 }
 0xb87   : > { %s2139_s24 = smov %s1848_s27  ;;  %19 = sbr.rel (!%p17_p2) target bundleno = 3 (0x3), region = 87 }
 0xb8e   :  { %1449 = vsyncpa [#allocation3], 1 }
 0xb8f   :  { %1451 = vsyncpa [#allocation3 + $0x1], 1 }

</bundles_post_ra>
